<compile_context>
chip_gen: v5e
topology: v5e:2x2
jax: 0.10.0
libtpu: 0.0.40
codegen_flags: <defaults>
</compile_context>

<pallas_src>
import jax
import jax.numpy as jnp
from jax.experimental import pallas as pl
from jax.experimental.pallas import tpu as pltpu

jax.config.update("jax_default_matmul_precision", "highest")

INPUT_DIM = 2
HIDDEN1 = 64
HIDDEN2 = 64


def wnet_kernel(x_ref, y_ref, w1a_ref, w1b_ref, b1_ref, w2_ref, b2_ref,
                w3_ref, b3_ref, out_ref):
    # x_ref / y_ref: (1, tm) sample tiles, samples on lanes.
    x = x_ref[...]
    y = y_ref[...]

    # fc1 + relu on the VPU: (64,1) * (1,tm) broadcast FMAs -> (64, tm)
    h1 = w1a_ref[...] * x + w1b_ref[...] * y + b1_ref[...]
    h1 = jnp.maximum(h1, 0.0)

    # fc2 + relu on the MXU: (64,64) @ (64,tm) -> (64, tm)
    h2 = jnp.dot(w2_ref[...], h1, preferred_element_type=jnp.float32) + b2_ref[...]
    h2 = jnp.maximum(h2, 0.0)

    # fc3 + abs on VPU/XLU: elementwise mul + sublane reduce -> (1, tm), lane-dense store
    w = jnp.sum(h2 * w3_ref[...], axis=0, keepdims=True) + b3_ref[0]
    out_ref[...] = jnp.abs(w)


def _choose_tile(n, tm_max=2048):
    # Lane-dense tiles (multiple of 128). Keep at least 2 grid steps when
    # possible so the "parallel" axis can be sharded across v7x's 2 TensorCores.
    if n <= 256:
        return 128
    half = (n // 2) // 128 * 128
    return max(128, min(tm_max, half))


def wnet_forward(x, y, params, *, tm=None):
    """Forward pass of WNet. x, y: (N,) or (N, 1) arrays. Returns (N,)."""
    x = jnp.asarray(x, jnp.float32).reshape(-1)
    y = jnp.asarray(y, jnp.float32).reshape(-1)
    n = x.shape[0]

    if tm is None:
        tm = _choose_tile(n)
    n_pad = pl.cdiv(n, tm) * tm
    if n_pad != n:
        x = jnp.pad(x, (0, n_pad - n))
        y = jnp.pad(y, (0, n_pad - n))
    xr = x.reshape(1, n_pad)
    yr = y.reshape(1, n_pad)

    w1, b1, w2, b2, w3, b3 = params          # torch Linear layout: (out, in)
    w1a = w1[:, 0:1]                         # (64, 1)
    w1b = w1[:, 1:2]                         # (64, 1)
    b1c = b1.reshape(HIDDEN1, 1)             # (64, 1)
    b2c = b2.reshape(HIDDEN2, 1)             # (64, 1)
    w3c = w3.reshape(1, HIDDEN2).T           # (64, 1)
    b3s = b3.reshape(1)                      # (1,) -> SMEM scalar

    out = pl.pallas_call(
        wnet_kernel,
        out_shape=jax.ShapeDtypeStruct((1, n_pad), jnp.float32),
        grid_spec=pltpu.PrefetchScalarGridSpec(
            num_scalar_prefetch=0,
            grid=(n_pad // tm,),
            in_specs=[
                pl.BlockSpec((1, tm), lambda i: (0, i)),             # x tile
                pl.BlockSpec((1, tm), lambda i: (0, i)),             # y tile
                pl.BlockSpec((HIDDEN1, 1), lambda i: (0, 0)),        # w1 col 0
                pl.BlockSpec((HIDDEN1, 1), lambda i: (0, 0)),        # w1 col 1
                pl.BlockSpec((HIDDEN1, 1), lambda i: (0, 0)),        # b1
                pl.BlockSpec((HIDDEN2, HIDDEN1), lambda i: (0, 0)),  # w2
                pl.BlockSpec((HIDDEN2, 1), lambda i: (0, 0)),        # b2
                pl.BlockSpec((HIDDEN2, 1), lambda i: (0, 0)),        # w3^T
                pl.BlockSpec(memory_space=pltpu.MemorySpace.SMEM),   # b3 scalar
            ],
            out_specs=pl.BlockSpec((1, tm), lambda i: (0, i)),       # lane-dense out
        ),
        compiler_params=pltpu.CompilerParams(
            dimension_semantics=("parallel",)),
    )(xr, yr, w1a, w1b, b1c, w2, b2c, w3c, b3s)

    return out[0, :n]   # drop padding; matches w.squeeze(-1)


def init_params(key):
    """Deterministic parameter init, shapes in torch Linear layout (out, in)."""
    k1, k2, k3, k4, k5, k6 = jax.random.split(key, 6)
    w1 = jax.random.normal(k1, (HIDDEN1, INPUT_DIM), jnp.float32) * 0.5
    b1 = jax.random.normal(k2, (HIDDEN1,), jnp.float32) * 0.1
    w2 = jax.random.normal(k3, (HIDDEN2, HIDDEN1), jnp.float32) * 0.1
    b2 = jax.random.normal(k4, (HIDDEN2,), jnp.float32) * 0.1
    w3 = jax.random.normal(k5, (1, HIDDEN2), jnp.float32) * 0.1
    b3 = jax.random.normal(k6, (1,), jnp.float32) * 0.1
    return (w1, b1, w2, b2, w3, b3)


def wnet_reference(x, y, params):
    """Pure-JAX reference mirroring the PyTorch forward."""
    w1, b1, w2, b2, w3, b3 = params
    x = x[:, None] if x.ndim == 1 else x
    y = y[:, None] if y.ndim == 1 else y
    z = jnp.concatenate([x, y], axis=-1).astype(jnp.float32)
    h1 = jnp.maximum(z @ w1.T + b1, 0.0)
    h2 = jnp.maximum(h1 @ w2.T + b2, 0.0)
    w = jnp.abs(h2 @ w3.T + b3)
    return w[:, 0]


if __name__ == "__main__":
    key = jax.random.PRNGKey(0)
    kp, kx, ky = jax.random.split(key, 3)

    params = init_params(kp)

    N = 1000  # deliberately not a multiple of the tile: exercises pad + tail slice
    x = jax.random.normal(kx, (N,), jnp.float32)
    y = jax.random.normal(ky, (N,), jnp.float32)

    out = wnet_forward(x, y, params)
    out = jax.block_until_ready(out)

    ref = wnet_reference(x, y, params)
    assert out.shape == (N,), out.shape
    assert jnp.allclose(out, ref, rtol=1e-4, atol=1e-5), (
        f"mismatch vs reference, max abs err = {jnp.max(jnp.abs(out - ref))}")

    print("KERNEL_OK")
</pallas_src>

<mosaic_0001>
module attributes {stable_mosaic.version = 11 : i64} {
  func.func @wnet_kernel(%arg0: i32, %arg1: memref<1x384xf32, #tpu.memory_space<vmem>>, %arg2: memref<1x384xf32, #tpu.memory_space<vmem>>, %arg3: memref<64x1xf32, #tpu.memory_space<vmem>>, %arg4: memref<64x1xf32, #tpu.memory_space<vmem>>, %arg5: memref<64x1xf32, #tpu.memory_space<vmem>>, %arg6: memref<64x64xf32, #tpu.memory_space<vmem>>, %arg7: memref<64x1xf32, #tpu.memory_space<vmem>>, %arg8: memref<64x1xf32, #tpu.memory_space<vmem>>, %arg9: memref<1xf32, #tpu.memory_space<smem>>, %arg10: memref<1x384xf32, #tpu.memory_space<vmem>>) attributes {dimension_semantics = [#tpu.dimension_semantics<parallel>], iteration_bounds = array<i64: 3>, scalar_prefetch = 0 : i64, scratch_operands = 0 : i64, tpu.core_type = #tpu.core_type<tc>, window_params = [{transform_indices = @transform_0, window_bounds = array<i64: 1, 384>}, {transform_indices = @transform_1, window_bounds = array<i64: 1, 384>}, {pipeline_mode = #tpu.pipeline_mode<synchronous>, transform_indices = @transform_2, window_bounds = array<i64: 64, 1>}, {pipeline_mode = #tpu.pipeline_mode<synchronous>, transform_indices = @transform_3, window_bounds = array<i64: 64, 1>}, {pipeline_mode = #tpu.pipeline_mode<synchronous>, transform_indices = @transform_4, window_bounds = array<i64: 64, 1>}, {pipeline_mode = #tpu.pipeline_mode<synchronous>, transform_indices = @transform_5, window_bounds = array<i64: 64, 64>}, {pipeline_mode = #tpu.pipeline_mode<synchronous>, transform_indices = @transform_6, window_bounds = array<i64: 64, 1>}, {pipeline_mode = #tpu.pipeline_mode<synchronous>, transform_indices = @transform_7, window_bounds = array<i64: 64, 1>}, {transform_indices = @transform_8, window_bounds = array<i64: 1>}, {transform_indices = @transform_9, window_bounds = array<i64: 1, 384>}]} {
    %c0 = arith.constant 0 : index
    %c0_0 = arith.constant 0 : index
    %0 = vector.load %arg1[%c0, %c0_0] : memref<1x384xf32, #tpu.memory_space<vmem>>, vector<1x384xf32>
    %c0_1 = arith.constant 0 : index
    %c0_2 = arith.constant 0 : index
    %1 = vector.load %arg2[%c0_1, %c0_2] : memref<1x384xf32, #tpu.memory_space<vmem>>, vector<1x384xf32>
    %c0_3 = arith.constant 0 : index
    %c0_4 = arith.constant 0 : index
    %2 = vector.load %arg3[%c0_3, %c0_4] : memref<64x1xf32, #tpu.memory_space<vmem>>, vector<64x1xf32>
    %3 = vector.broadcast %2 : vector<64x1xf32> to vector<64x384xf32>
    %4 = vector.broadcast %0 : vector<1x384xf32> to vector<64x384xf32>
    %5 = arith.mulf %3, %4 : vector<64x384xf32>
    %c0_5 = arith.constant 0 : index
    %c0_6 = arith.constant 0 : index
    %6 = vector.load %arg4[%c0_5, %c0_6] : memref<64x1xf32, #tpu.memory_space<vmem>>, vector<64x1xf32>
    %7 = vector.broadcast %6 : vector<64x1xf32> to vector<64x384xf32>
    %8 = vector.broadcast %1 : vector<1x384xf32> to vector<64x384xf32>
    %9 = arith.mulf %7, %8 : vector<64x384xf32>
    %10 = arith.addf %5, %9 : vector<64x384xf32>
    %c0_7 = arith.constant 0 : index
    %c0_8 = arith.constant 0 : index
    %11 = vector.load %arg5[%c0_7, %c0_8] : memref<64x1xf32, #tpu.memory_space<vmem>>, vector<64x1xf32>
    %12 = vector.broadcast %11 : vector<64x1xf32> to vector<64x384xf32>
    %13 = arith.addf %10, %12 : vector<64x384xf32>
    %cst = arith.constant 0.000000e+00 : f32
    %14 = vector.broadcast %cst : f32 to vector<64x384xf32>
    %15 = arith.maximumf %13, %14 : vector<64x384xf32>
    %c0_9 = arith.constant 0 : index
    %c0_10 = arith.constant 0 : index
    %16 = vector.load %arg6[%c0_9, %c0_10] : memref<64x64xf32, #tpu.memory_space<vmem>>, vector<64x64xf32>
    %cst_11 = arith.constant dense<0.000000e+00> : vector<64x384xf32>
    %17 = tpu.matmul %16, %15, %cst_11 {dimension_numbers = #tpu.dot_dimension_numbers<[1], [0], [0], [1], [0, 0, 1, 1], [], []>, precision = #tpu.contract_precision<fp32>} : vector<64x64xf32>, vector<64x384xf32>, vector<64x384xf32> -> vector<64x384xf32>
    %c0_12 = arith.constant 0 : index
    %c0_13 = arith.constant 0 : index
    %18 = vector.load %arg7[%c0_12, %c0_13] : memref<64x1xf32, #tpu.memory_space<vmem>>, vector<64x1xf32>
    %19 = vector.broadcast %18 : vector<64x1xf32> to vector<64x384xf32>
    %20 = arith.addf %17, %19 : vector<64x384xf32>
    %cst_14 = arith.constant 0.000000e+00 : f32
    %21 = vector.broadcast %cst_14 : f32 to vector<64x384xf32>
    %22 = arith.maximumf %20, %21 : vector<64x384xf32>
    %c0_15 = arith.constant 0 : index
    %c0_16 = arith.constant 0 : index
    %23 = vector.load %arg8[%c0_15, %c0_16] : memref<64x1xf32, #tpu.memory_space<vmem>>, vector<64x1xf32>
    %24 = vector.broadcast %23 : vector<64x1xf32> to vector<64x384xf32>
    %25 = arith.mulf %22, %24 : vector<64x384xf32>
    %cst_17 = arith.constant dense<0.000000e+00> : vector<384xf32>
    %26 = vector.multi_reduction <add>, %25, %cst_17 [0] : vector<64x384xf32> to vector<384xf32>
    %27 = vector.shape_cast %26 : vector<384xf32> to vector<1x384xf32>
    %c0_18 = arith.constant 0 : index
    %28 = memref.load %arg9[%c0_18] : memref<1xf32, #tpu.memory_space<smem>>
    %29 = vector.broadcast %28 : f32 to vector<1x384xf32>
    %30 = arith.addf %27, %29 : vector<1x384xf32>
    %31 = math.absf %30 : vector<1x384xf32>
    %c0_19 = arith.constant 0 : index
    %c0_20 = arith.constant 0 : index
    %32 = vector.load %arg10[%c0_19, %c0_20] : memref<1x384xf32, #tpu.memory_space<vmem>>, vector<1x384xf32>
    tpu.vector_store %arg10[%c0_19, %c0_20], %31 {strides = array<i32>} : memref<1x384xf32, #tpu.memory_space<vmem>>, vector<1x384xf32>,
    return
  }
  func.func @transform_0(%arg0: i32) -> (i32, i32) {
    %c0_i32 = arith.constant 0 : i32
    %c0_i32_0 = arith.constant 0 : i32
    return %c0_i32, %arg0 : i32, i32
  }
  func.func @transform_1(%arg0: i32) -> (i32, i32) {
    %c0_i32 = arith.constant 0 : i32
    %c0_i32_0 = arith.constant 0 : i32
    return %c0_i32, %arg0 : i32, i32
  }
  func.func @transform_2(%arg0: i32) -> (i32, i32) {
    %c0_i32 = arith.constant 0 : i32
    %c0_i32_0 = arith.constant 0 : i32
    %c0_i32_1 = arith.constant 0 : i32
    return %c0_i32, %c0_i32_0 : i32, i32
  }
  func.func @transform_3(%arg0: i32) -> (i32, i32) {
    %c0_i32 = arith.constant 0 : i32
    %c0_i32_0 = arith.constant 0 : i32
    %c0_i32_1 = arith.constant 0 : i32
    return %c0_i32, %c0_i32_0 : i32, i32
  }
  func.func @transform_4(%arg0: i32) -> (i32, i32) {
    %c0_i32 = arith.constant 0 : i32
    %c0_i32_0 = arith.constant 0 : i32
    %c0_i32_1 = arith.constant 0 : i32
    return %c0_i32, %c0_i32_0 : i32, i32
  }
  func.func @transform_5(%arg0: i32) -> (i32, i32) {
    %c0_i32 = arith.constant 0 : i32
    %c0_i32_0 = arith.constant 0 : i32
    %c0_i32_1 = arith.constant 0 : i32
    return %c0_i32, %c0_i32_0 : i32, i32
  }
  func.func @transform_6(%arg0: i32) -> (i32, i32) {
    %c0_i32 = arith.constant 0 : i32
    %c0_i32_0 = arith.constant 0 : i32
    %c0_i32_1 = arith.constant 0 : i32
    return %c0_i32, %c0_i32_0 : i32, i32
  }
  func.func @transform_7(%arg0: i32) -> (i32, i32) {
    %c0_i32 = arith.constant 0 : i32
    %c0_i32_0 = arith.constant 0 : i32
    %c0_i32_1 = arith.constant 0 : i32
    return %c0_i32, %c0_i32_0 : i32, i32
  }
  func.func @transform_8(%arg0: i32) -> i32 {
    %c0_i32 = arith.constant 0 : i32
    %c0_i32_0 = arith.constant 0 : i32
    return %c0_i32 : i32
  }
  func.func @transform_9(%arg0: i32) -> (i32, i32) {
    %c0_i32 = arith.constant 0 : i32
    %c0_i32_0 = arith.constant 0 : i32
    return %c0_i32, %arg0 : i32, i32
  }
}

</mosaic_0001>

<bundles_post_ra>
// kernel: tpu_custom_call.1
= control target key start
LH: loop header
LB: loop body
LE: loop exit
PB: predicated region body
PF: predicated region fallthrough
CT: control target
= control target key end

     0   :  { %s3724_s0 = inlined_call_operand.vmem [shape: f32[1,1152], index: 0, kind: input, shape index: {}]   ;;  %s3725_s1 = inlined_call_operand.vmem [shape: f32[1,1152], index: 1, kind: input, shape index: {}]   ;;  %s3726_s2 = inlined_call_operand.vmem [shape: f32[64,1], index: 2, kind: input, shape index: {}]   ;;  %s3727_s3 = inlined_call_operand.vmem [shape: f32[64,1], index: 3, kind: input, shape index: {}]   ;;  %s3728_s4 = inlined_call_operand.vmem [shape: f32[64,1], index: 4, kind: input, shape index: {}]   ;;  %s3729_s5 = inlined_call_operand.vmem [shape: f32[64,64], index: 5, kind: input, shape index: {}]   ;;  %s3730_s6 = inlined_call_operand.vmem [shape: f32[64,1], index: 6, kind: input, shape index: {}]   ;;  %s3731_s7 = inlined_call_operand.vmem [shape: f32[64,1], index: 7, kind: input, shape index: {}]   ;;  %s3732_s8 = inlined_call_operand.<no memory space> [shape: f32[1], index: 8, kind: input, shape index: {}]   ;;  %s3733_s9 = inlined_call_operand.hbm [shape: f32[1,1152], index: 9, kind: output, shape index: {}]  }
   0x1   :  { %14 = sst [smem:[#allocation2]] %s3732_s8 }
   0x2   :  { %15 = vsyncpa [#allocation4], 0 }
   0x3   :  { %17 = vsyncpa [#allocation4 + $0x1], 0  ;;  %s2497_s11 = smov 0   ;;  %s2499_s12 = smov 0  }
   0x4   :  { %s2501_s13 = smov 0   ;;  %s2503_s14 = smov 0  }
   0x5 LB: > { %s2312_s8 = sadd.s32 4294967295, %s2441_s14   ;;  %s2313_s15 = sadd.s32 4294967294, %s2441_s14   ;;  %s2441_s14 = sphi %s2503_s14, %s3835_s14   ;;  %s2437_s13 = sphi %s2501_s13, %s3834_s13   ;;  %s2433_s12 = sphi %s2499_s12, %s3833_s12   ;;  %s2429_s11 = sphi %s2497_s11, %s3832_s11  }
   0x6   : > { %s2520_s16 = sadd.s32 1, %s2441_s14   ;;  %s229_s17 = sadd.s32 1, %s2437_s13 }
   0x7   : > { %s226_s18 = ssub.s32 %s2441_s14, %s2520_s16  ;;  %p239_p0 = scmp.ne.s32.totalorder %s2437_s13, %s2433_s12 }
   0x8   : > { %p227_p1 = scmp.eq.s32.totalorder %s226_s18, 0  ;;  %p240_p2 = scmp.eq.s32.totalorder %s2312_s8, 2 }
   0x9   : > { %p245_p3 = scmp.ne.s32.totalorder %s2433_s12, %s2429_s11  ;;  %p246_p4 = scmp.eq.s32.totalorder %s2313_s15, 2 }
   0xa   : > { %s2532_s19 = scalar_select %p227_p1, %s2437_s13, %s229_s17  }
   0xb   : > { %p2534_p5 = por %p240_p2, %p239_p0  ;;  %p2538_p6 = por %p246_p4, %p245_p3 }
   0xc   : > { %p2316_p7 = scmp.ge.s32.totalorder %s2441_s14, 1  ;;  %p301_p8 = scmp.lt.s32.totalorder %s2441_s14, 4 }
   0xe   : > { %p302_p9 = pnand %p2316_p7, %p301_p8 }
  0x10   : > { %305 = sbr.rel (%p302_p9) target bundleno = 676 (0x2a4), region = 56 }
  0x15   : > { %v360_v0 = vld [vmem:[%s3726_s2 + $0x38] sm:$0xff]  ;;  %v359_v1 = vld [vmem:[%s3726_s2 + $0x30] sm:$0xff]  ;;  %v358_v2 = vld [vmem:[%s3726_s2 + $0x28] sm:$0xff]  ;;  %v2443_v3 = vmov 0   ;;  %s2636_s30 = smul.u32 3, %s2312_s8  ;;  %vm687_vm0 = vcmask 523264  }
  0x16   : > { %2378 = vset.pattern.permute.xlu2 %v2443_v3  ;;  %2377 = vset.pattern.permute.xlu1 %v2443_v3  ;;  %v438_v4 = vld [vmem:[%s3727_s3 + $0x30] sm:$0xff]  ;;  %v439_v5 = vld [vmem:[%s3727_s3 + $0x38] sm:$0xff]  ;;  %v437_v6 = vld [vmem:[%s3727_s3 + $0x28] sm:$0xff]  ;;  %s2209_s22 = sld [smem:[#allocation2]]  ;;  %vm2222_vm1 = vcmask 1040384   ;;  %vm2224_vm2 = vcmask 1041408  }
  0x17   : > { %2376 = vset.pattern.permute.xlu0 %v2443_v3  ;;  %393 = vperm.xlu1 %2377, %v359_v1   ;;  %v357_v7 = vld [vmem:[%s3726_s2 + $0x20] sm:$0xff]  ;;  %v542_v8 = vld [vmem:[%s3728_s4 + $0x38] sm:$0xff]  ;;  %v541_v11 = vld [vmem:[%s3728_s4 + $0x30] sm:$0xff]  ;;  %p341_p10 = scmp.lt.s32.totalorder %s2636_s30, 8  ;;  %s2243_s27 = scalar_lea.hbm %s3733_s9, %s2636_s30 }
  0x18   : > { %398 = vperm.xlu0 %2376, %v360_v0   ;;  %388 = vperm.xlu2 %2378, %v358_v2   ;;  %v436_v9 = vld [vmem:[%s3727_s3 + $0x20] sm:$0xff]  ;;  %v356_v10 = vld [vmem:[%s3726_s2 + $0x18] sm:$0xff]  ;;  %v355_v13 = vld [vmem:[%s3726_s2 + $0x10] sm:$0xff] }
  0x19   : > { %v435_v12 = vld [vmem:[%s3727_s3 + $0x18] sm:$0xff]  ;;  %v540_v14 = vld [vmem:[%s3728_s4 + $0x28] sm:$0xff]  ;;  %v434_v15 = vld [vmem:[%s3727_s3 + $0x10] sm:$0xff]  ;;  %s342_s8 = scalar_select %p341_p10, %s2636_s30, 8 }
  0x1a   : > { %v354_v16 = vld [vmem:[%s3726_s2 + $0x8] sm:$0xff]  ;;  %v539_v17 = vld [vmem:[%s3728_s4 + $0x20] sm:$0xff]  ;;  %v538_v20 = vld [vmem:[%s3728_s4 + $0x18] sm:$0xff] }
  0x1b   : > { %v433_v18 = vld [vmem:[%s3727_s3 + $0x8] sm:$0xff]  ;;  %v353_v19 = vld [vmem:[%s3726_s2] sm:$0xff]  ;;  %v537_v23 = vld [vmem:[%s3728_s4 + $0x10] sm:$0xff]  ;;  %s343_s26 = scalar_lea.vmem %s3724_s0, %s342_s8  ;;  %s348_s23 = scalar_lea.vmem %s3725_s1, %s342_s8 }
  0x1c   : > { %v432_v21 = vld [vmem:[%s3727_s3] sm:$0xff]  ;;  %v536_v22 = vld [vmem:[%s3728_s4 + $0x8] sm:$0xff]  ;;  %v641_v27 = vld [vmem:[%s3730_s6 + $0x10] sm:$0xff]  ;;  %s2247_s8 = sshll.u32 %s2243_s27, 4  ;;  %s2248_s8 = int_to_ptr.hbm [resolvable:$true] %s2247_s8 }
  0x1d   : > { %v535_v24 = vld [vmem:[%s3728_s4] sm:$0xff]  ;;  %v640_v25 = vld [vmem:[%s3730_s6 + $0x8] sm:$0xff]  ;;  %v642_v29 = vld [vmem:[%s3730_s6 + $0x18] sm:$0xff]  ;;  %s2393_s15 = sshra.s32 %s2248_s8, 4  ;;  %s2394_s15 = int_to_ptr.hbm [resolvable:$true] %s2393_s15 }
  0x1e   : > { %v639_v26 = vld [vmem:[%s3730_s6] sm:$0xff]  ;;  %v644_v30 = vld [vmem:[%s3730_s6 + $0x28] sm:$0xff]  ;;  %v646_v31 = vld [vmem:[%s3730_s6 + $0x38] sm:$0xff]  ;;  %s2395_s30 = scalar_lea.hbm %s2394_s15, 3  ;;  %p2400_p0 = scmp.lt.s32.totalorder %s2394_s15, %s3733_s9 }
  0x1f   : > { %472 = vperm.xlu1 %2377, %v438_v4   ;;  %v643_v28 = vld [vmem:[%s3730_s6 + $0x20] sm:$0xff]  ;;  %v645_v32 = vld [vmem:[%s3730_s6 + $0x30] sm:$0xff]  ;;  %v2099_v35 = vld [vmem:[%s3731_s7 + $0x8] sm:$0xff]  ;;  %p2396_p11 = scmp.ne.s32.totalorder %s2394_s15, %s2395_s30 }
  0x20   : > { %477 = vperm.xlu0 %2376, %v439_v5   ;;  %467 = vperm.xlu2 %2378, %v437_v6   ;;  %v2098_v33 = vld [vmem:[%s3731_s7] sm:$0xff]  ;;  %v2100_v34 = vld [vmem:[%s3731_s7 + $0x10] sm:$0xff]  ;;  %v2101_v36 = vld [vmem:[%s3731_s7 + $0x18] sm:$0xff] }
  0x21   : > { %v351_v37 = vld [vmem:[%s343_s26] sm:$0x7]  ;;  %v2103_v41 = vld [vmem:[%s3731_s7 + $0x28] sm:$0xff]  ;;  %v2104_v44 = vld [vmem:[%s3731_s7 + $0x30] sm:$0xff]  ;;  %p2397_p12 = pnand %p2396_p11, %p2534_p5 }
  0x22   : > { %v2661_v38 = vperm.slane %v351_v37, 2  ;;  %v352_v42 = vld [vmem:[%s348_s23] sm:$0x7]  ;;  %v2679_v45 = vperm.slane %v351_v37, 1  ;;  %v2105_v52 = vld [vmem:[%s3731_s7 + $0x38] sm:$0xff]  ;;  %v2706_v0 = vperm.slane %v351_v37, 0 }
  0x23   : > { %v2102_v43 = vld [vmem:[%s3731_s7 + $0x20] sm:$0xff]  ;;  %v2681_v46 = vperm.slane %v352_v42, 1  ;;  %v2683_v47 = vperm.slane %v352_v42, 2  ;;  %v2713_v6 = vperm.slane %v352_v42, 0  ;;  %s337_s23 = sand.u32 1, %s2433_s12   ;;  %p2398_p13 = pneg %p2397_p12 }
  0x24   : > { %s2335_s24 = smul.u32 3, %s337_s23  ;;  %s2233_s10 = scalar_lea.sflag [#allocation4], %s337_s23 }
  0x26   : > { %s339_s28 = scalar_lea.vmem [#allocation3], %s2335_s24 }
  0x27   : > { %383 = vperm.xlu1 %2377, %v357_v7   ;;  %s2245_s29 = sshll.u32 %s339_s28, 4  ;;  %s2246_s29 = int_to_ptr.vmem [resolvable:$true] %s2245_s29 }
  0x28   : > { %580 = vperm.xlu0 %2376, %v542_v8   ;;  %462 = vperm.xlu2 %2378, %v436_v9  }
  0x2f   : > { %378 = vperm.xlu1 %2377, %v356_v10  }
  0x30   : > { %575 = vperm.xlu0 %2376, %v541_v11   ;;  %457 = vperm.xlu2 %2378, %v435_v12  }
  0x37   : > { %373 = vperm.xlu1 %2377, %v355_v13  }
  0x38   : > { %570 = vperm.xlu0 %2376, %v540_v14   ;;  %452 = vperm.xlu2 %2378, %v434_v15  }
  0x3f   : > { %368 = vperm.xlu1 %2377, %v354_v16  }
  0x40   : > { %565 = vperm.xlu0 %2376, %v539_v17   ;;  %447 = vperm.xlu2 %2378, %v433_v18  }
  0x47   : > { %363 = vperm.xlu1 %2377, %v353_v19  }
  0x48   : > { %560 = vperm.xlu0 %2376, %v538_v20   ;;  %442 = vperm.xlu2 %2378, %v432_v21  }
  0x4f   : > { %550 = vperm.xlu1 %2377, %v536_v22  }
  0x50   : > { %555 = vperm.xlu0 %2376, %v537_v23   ;;  %545 = vperm.xlu2 %2378, %v535_v24  }
  0x57   : > { %654 = vperm.xlu1 %2377, %v640_v25  }
  0x58   : > { %649 = vperm.xlu0 %2376, %v639_v26   ;;  %659 = vperm.xlu2 %2378, %v641_v27  }
  0x5f   : > { %669 = vperm.xlu1 %2377, %v643_v28  }
  0x60   : > { %664 = vperm.xlu0 %2376, %v642_v29   ;;  %674 = vperm.xlu2 %2378, %v644_v30  }
  0x67   : > { %684 = vperm.xlu1 %2377, %v646_v31  }
  0x68   : > { %679 = vperm.xlu0 %2376, %v645_v32   ;;  %2108 = vperm.xlu2 %2378, %v2098_v33  }
  0x6f   : > { %2118 = vperm.xlu1 %2377, %v2100_v34  }
  0x70   : > { %2113 = vperm.xlu0 %2376, %v2099_v35   ;;  %2123 = vperm.xlu2 %2378, %v2101_v36  }
  0x72   : > { %v2666_v39 = vpop.permute.xlu2 %388 }
  0x73   : > { %v425_v40 = vmul.f32 %v2661_v38, %v2666_v39  ;;  %v424_v48 = vmul.f32 %v2679_v45, %v2666_v39 }
  0x77   : > { %2133 = vperm.xlu1 %2377, %v2103_v41  }
  0x78   : > { %2128 = vperm.xlu0 %2376, %v2102_v43   ;;  %2138 = vperm.xlu2 %2378, %v2104_v44  }
  0x7a   : > { %v468_v49 = vpop.permute.xlu2 %467 }
  0x7b   : > { %v503_v50 = vmul.f32 %v2681_v46, %v468_v49  ;;  %v504_v51 = vmul.f32 %v2683_v47, %v468_v49  ;;  %v502_v41 = vmul.f32 %v2713_v6, %v468_v49 }
  0x7d   : > { %v2692_v53 = vadd.f32 %v503_v50, %v424_v48  ;;  %v2694_v54 = vadd.f32 %v504_v51, %v425_v40  ;;  %v423_v40 = vmul.f32 %v2706_v0, %v2666_v39 }
  0x80   : > { %2143 = vperm.xlu0 %2376, %v2105_v52   ;;  %v526_v52 = vadd.f32 %v502_v41, %v423_v40 }
  0x82   : > { %v2696_v55 = vpop.permute.xlu2 %462 }
  0x83   : > { %v501_v56 = vmul.f32 %v2683_v47, %v2696_v55 }
  0x89   : > { %v394_v57 = vpop.permute.xlu1 %393 }
  0x8a   : > { %v399_v58 = vpop.permute.xlu0 %398  ;;  %v428_v59 = vmul.f32 %v2661_v38, %v394_v57  ;;  %v2701_v60 = vpop.permute.xlu2 %457  ;;  %v427_v1 = vmul.f32 %v2679_v45, %v394_v57  ;;  %v426_v28 = vmul.f32 %v2706_v0, %v394_v57 }
  0x8b   : > { %v431_v61 = vmul.f32 %v2661_v38, %v399_v58  ;;  %v498_v62 = vmul.f32 %v2683_v47, %v2701_v60  ;;  %v430_v7 = vmul.f32 %v2679_v45, %v399_v58  ;;  %v429_v16 = vmul.f32 %v2706_v0, %v399_v58 }
  0x91   : > { %v473_v63 = vpop.permute.xlu1 %472 }
  0x92   : > { %v478_v2 = vpop.permute.xlu0 %477  ;;  %v506_v3 = vmul.f32 %v2681_v46, %v473_v63  ;;  %v507_v4 = vmul.f32 %v2683_v47, %v473_v63  ;;  %v2711_v5 = vpop.permute.xlu2 %452  ;;  %v505_v25 = vmul.f32 %v2713_v6, %v473_v63 }
  0x93   : > { %v509_v8 = vmul.f32 %v2681_v46, %v478_v2  ;;  %v510_v9 = vmul.f32 %v2683_v47, %v478_v2  ;;  %v495_v10 = vmul.f32 %v2683_v47, %v2711_v5  ;;  %v508_v12 = vmul.f32 %v2713_v6, %v478_v2 }
  0x94   : > { %v2720_v11 = vadd.f32 %v506_v3, %v427_v1  ;;  %v531_v15 = vadd.f32 %v507_v4, %v428_v59  ;;  %v529_v31 = vadd.f32 %v505_v25, %v426_v28  ;;  %v499_v2 = vmul.f32 %v2713_v6, %v2696_v55 }
  0x95   : > { %v2723_v13 = vadd.f32 %v509_v8, %v430_v7  ;;  %v534_v14 = vadd.f32 %v510_v9, %v431_v61  ;;  %v532_v17 = vadd.f32 %v508_v12, %v429_v16 }
  0x99   : > { %v2726_v18 = vpop.permute.xlu1 %383 }
  0x9a   : > { %v2728_v19 = vpop.permute.xlu0 %580  ;;  %v2730_v20 = vpop.permute.xlu2 %447  ;;  %v422_v21 = vmul.f32 %v2661_v38, %v2726_v18 }
  0x9b   : > { %v604_v22 = vadd.f32 %v2728_v19, %v532_v17  ;;  %v2736_v23 = vadd.f32 %v2728_v19, %v534_v14  ;;  %v492_v24 = vmul.f32 %v2683_v47, %v2730_v20 }
  0x9c   : > { %v525_v27 = vadd.f32 %v501_v56, %v422_v21  ;;  %v631_v21 = vld [vmem:[%s3729_s5] sm:$0xff] }
  0x9d   : > { %v628_v26 = vmax.f32 %v604_v22, 0.0  ;;  %v635_v22 = vld [vmem:[%s3729_s5 + $0x20] sm:$0xff] }
  0x9f   : > { %v2742_v29 = vand.u32 4294901760, %v628_v26 }
  0xa1   : > { %v2745_v30 = vsub.f32 %v628_v26, %v2742_v29  ;;  %721 = vmatpush.msra.mxu0 %v2742_v29  ;;  %2319 = vmatpush.msra.mxu2 %v2742_v29  ;;  %v2749_v32 = vpop.permute.xlu1 %378 }
  0xa2   : > { %v2751_v33 = vpop.permute.xlu0 %575  ;;  %v419_v34 = vmul.f32 %v2661_v38, %v2749_v32  ;;  %v2807_v12 = vpop.permute.xlu2 %442  ;;  %v417_v25 = vmul.f32 %v2706_v0, %v2749_v32 }
  0xa3   : > { %v601_v35 = vadd.f32 %v2751_v33, %v529_v31  ;;  %v2757_v36 = vadd.f32 %v2751_v33, %v531_v15  ;;  %v3737_v37 = vand.u32 4294901760, %v2745_v30  ;;  %v487_v40 = vmul.f32 %v2713_v6, %v2807_v12 }
  0xa4   : > { %v522_v44 = vadd.f32 %v498_v62, %v419_v34  ;;  %v420_v62 = vmul.f32 %v2706_v0, %v2726_v18  ;;  %v689_v34 = vsel %vm687_vm0, %v631_v21, 0  ;;  %v489_v41 = vmul.f32 %v2683_v47, %v2807_v12 }
  0xa5   : > { %v625_v42 = vmax.f32 %v601_v35, 0.0  ;;  %v812_v43 = vsub.f32 %v2745_v30, %v3737_v37  ;;  %v701_v35 = vsel %vm687_vm0, %v635_v22, 0 }
  0xa6   : > { %v523_v7 = vadd.f32 %v499_v2, %v420_v62  ;;  %v2852_v62 = vand.u32 4294901760, %v701_v35 }
  0xa7   : > { %v2766_v48 = vand.u32 4294901760, %v625_v42  ;;  %v813_v50 = vand.u32 4294901760, %v812_v43 }
  0xa9   : > { %v2769_v51 = vsub.f32 %v625_v42, %v2766_v48  ;;  %723 = vmatpush.msra.mxu0 %v2766_v48  ;;  %2320 = vmatpush.msra.mxu2 %v2766_v48  ;;  %v2773_v39 = vpop.permute.xlu1 %373 }
  0xaa   : > { %814 = vmatpush.msra.mxu1 %v813_v50  ;;  %2327 = vmatpush.msra.mxu3 %v813_v50  ;;  %v2775_v49 = vpop.permute.xlu0 %570  ;;  %v416_v56 = vmul.f32 %v2661_v38, %v2773_v39  ;;  %v414_v21 = vmul.f32 %v2706_v0, %v2773_v39 }
  0xab   : > { %v598_v57 = vadd.f32 %v2775_v49, %v526_v52  ;;  %v2782_v58 = vadd.f32 %v2775_v49, %v2694_v54  ;;  %v3736_v59 = vand.u32 4294901760, %v2769_v51 }
  0xac   : > { %v2785_v61 = vadd.f32 %v495_v10, %v416_v56 }
  0xad   : > { %v622_v63 = vmax.f32 %v598_v57, 0.0  ;;  %v818_v1 = vsub.f32 %v2769_v51, %v3736_v59  ;;  %v2850_v57 = vand.u32 4294901760, %v689_v34 }
  0xae   : > { %3774 = vst [vmem:[#allocation6_spill] sm:$0xff] %v2785_v61 }
  0xaf   : > { %v2794_v3 = vand.u32 4294901760, %v622_v63  ;;  %v819_v4 = vand.u32 4294901760, %v818_v1 }
  0xb1   : > { %v2797_v54 = vsub.f32 %v622_v63, %v2794_v3  ;;  %725 = vmatpush.msra.mxu0 %v2794_v3  ;;  %2321 = vmatpush.msra.mxu2 %v2794_v3  ;;  %v2801_v8 = vpop.permute.xlu1 %368 }
  0xb2   : > { %820 = vmatpush.msra.mxu1 %v819_v4  ;;  %2328 = vmatpush.msra.mxu3 %v819_v4  ;;  %v2803_v9 = vpop.permute.xlu0 %565  ;;  %v413_v10 = vmul.f32 %v2661_v38, %v2801_v8  ;;  %v411_v4 = vmul.f32 %v2706_v0, %v2801_v8 }
  0xb3   : > { %v595_v14 = vadd.f32 %v2803_v9, %v523_v7  ;;  %v2811_v15 = vadd.f32 %v2803_v9, %v525_v27  ;;  %v3735_v16 = vand.u32 4294901760, %v2797_v54 }
  0xb4   : > { %v2814_v17 = vadd.f32 %v492_v24, %v413_v10  ;;  %v496_v24 = vmul.f32 %v2713_v6, %v2701_v60 }
  0xb5   : > { %3775 = vst [vmem:[#allocation7_spill] sm:$0xff] %v2811_v15  ;;  %v619_v26 = vmax.f32 %v595_v14, 0.0  ;;  %v824_v27 = vsub.f32 %v2797_v54, %v3735_v16  ;;  %v2866_v14 = vpop.permute.xlu2 %545  ;;  %v3789_v15 = vand.u32 4294901760, %v2769_v51 }
  0xb6   : > { %3776 = vst [vmem:[#allocation8_spill] sm:$0xff] %v2814_v17  ;;  %v520_v43 = vadd.f32 %v496_v24, %v417_v25  ;;  %v636_v25 = vld [vmem:[%s3729_s5 + $0x28] sm:$0xff]  ;;  %v2880_v24 = vsub.f32 %v689_v34, %v2850_v57 }
  0xb7   : > { %v2829_v28 = vand.u32 4294901760, %v619_v26  ;;  %v825_v31 = vand.u32 4294901760, %v824_v27 }
  0xb8   : > { %3779 = vst [vmem:[#allocation11_spill] sm:$0xff] %v2880_v24 }
  0xb9   : > { %v2838_v42 = vsub.f32 %v619_v26, %v2829_v28  ;;  %727 = vmatpush.msra.mxu0 %v2829_v28  ;;  %2322 = vmatpush.msra.mxu2 %v2829_v28  ;;  %v2842_v50 = vpop.permute.xlu1 %363  ;;  %v490_v26 = vmul.f32 %v2713_v6, %v2730_v20 }
  0xba   : > { %826 = vmatpush.msra.mxu1 %v825_v31  ;;  %2329 = vmatpush.msra.mxu3 %v825_v31  ;;  %v2844_v52 = vpop.permute.xlu0 %560  ;;  %v408_v56 = vmul.f32 %v2706_v0, %v2842_v50  ;;  %v410_v47 = vmul.f32 %v2661_v38, %v2842_v50  ;;  %v632_v38 = vld [vmem:[%s3729_s5 + $0x8] sm:$0xff]  ;;  %v2883_v31 = vsub.f32 %v701_v35, %v2852_v62 }
  0xbb   : > { %v592_v63 = vadd.f32 %v2844_v52, %v520_v43  ;;  %v2856_v1 = vadd.f32 %v2844_v52, %v522_v44  ;;  %v3734_v2 = vand.u32 4294901760, %v2838_v42  ;;  %v493_v0 = vmul.f32 %v2713_v6, %v2711_v5 }
  0xbc   : > { %v511_v7 = vadd.f32 %v487_v40, %v408_v56  ;;  %v2861_v10 = vadd.f32 %v489_v41, %v410_v47  ;;  %3780 = vst [vmem:[#allocation12_spill] sm:$0xff] %v2883_v31  ;;  %v692_v43 = vsel %vm687_vm0, %v632_v38, 0  ;;  %v514_v47 = vadd.f32 %v490_v26, %v411_v4 }
  0xbd   : > { %3777 = vst [vmem:[#allocation9_spill] sm:$0xff] %v2856_v1  ;;  %v616_v22 = vmax.f32 %v592_v63, 0.0  ;;  %v830_v44 = vsub.f32 %v2838_v42, %v3734_v2  ;;  %v704_v63 = vsel %vm687_vm0, %v636_v25, 0  ;;  %v517_v34 = vadd.f32 %v493_v0, %v414_v21 }
  0xbe   : > { %3778 = vst [vmem:[#allocation10_spill] sm:$0xff] %v2861_v10  ;;  %v583_v27 = vadd.f32 %v2866_v14, %v511_v7  ;;  %v2902_v4 = vand.u32 4294901760, %v2880_v24  ;;  %v2911_v26 = vand.u32 4294901760, %v704_v63 }
  0xbf   : > { %v2887_v40 = vand.u32 4294901760, %v616_v22  ;;  %v831_v41 = vand.u32 4294901760, %v830_v44  ;;  %v2905_v44 = vand.u32 4294901760, %v2883_v31 }
  0xc0   : > { %v607_v56 = vmax.f32 %v583_v27, 0.0  ;;  %3781 = vst [vmem:[#allocation13_spill] sm:$0xff] %v2902_v4  ;;  %v739_v16 = vsub.f32 %v2880_v24, %v2902_v4  ;;  %v633_v4 = vld [vmem:[%s3729_s5 + $0x10] sm:$0xff] }
  0xc1   : > { %v2892_v7 = vsub.f32 %v616_v22, %v2887_v40  ;;  %729 = vmatpush.msra.mxu0 %v2887_v40  ;;  %2323 = vmatpush.msra.mxu2 %v2887_v40  ;;  %v2896_v35 = vpop.permute.xlu1 %550  ;;  %3782 = vst [vmem:[#allocation14_spill] sm:$0xff] %v2905_v44  ;;  %v2907_v22 = vand.u32 4294901760, %v692_v43 }
  0xc2   : > { %832 = vmatpush.msra.mxu1 %v831_v41  ;;  %2330 = vmatpush.msra.mxu3 %v831_v41  ;;  %v2898_v6 = vpop.permute.xlu0 %555  ;;  %v586_v38 = vadd.f32 %v2896_v35, %v514_v47  ;;  %v2913_v27 = vand.u32 4294901760, %v607_v56 }
  0xc3   : > { %v589_v25 = vadd.f32 %v2898_v6, %v517_v34  ;;  %v3738_v21 = vand.u32 4294901760, %v2892_v7  ;;  %v771_v34 = vsub.f32 %v2883_v31, %v2905_v44  ;;  %v2925_v59 = vsub.f32 %v692_v43, %v2907_v22  ;;  %v637_v43 = vld [vmem:[%s3729_s5 + $0x30] sm:$0xff] }
  0xc4   : > { %v610_v0 = vmax.f32 %v586_v38, 0.0  ;;  %v2930_v38 = vsub.f32 %v704_v63, %v2911_v26  ;;  %v2949_v63 = vand.u32 4294901760, %v739_v16  ;;  %v707_v16 = vsel %vm687_vm0, %v637_v43, 0 }
  0xc5   : > { %v613_v41 = vmax.f32 %v589_v25, 0.0  ;;  %v836_v47 = vsub.f32 %v2892_v7, %v3738_v21  ;;  %v2936_v21 = vsub.f32 %v607_v56, %v2913_v27  ;;  %v2951_v56 = vand.u32 4294901760, %v771_v34 }
  0xc6   : > { %v2918_v2 = vand.u32 4294901760, %v610_v0  ;;  %3783 = vst [vmem:[#allocation15_spill] sm:$0xff] %v2949_v63  ;;  %v2961_v31 = vand.u32 4294901760, %v2930_v38  ;;  %v2978_v43 = vand.u32 4294901760, %v707_v16  ;;  %v3787_v34 = vand.u32 4294901760, %v2745_v30 }
  0xc7   : > { %v2927_v37 = vand.u32 4294901760, %v613_v41  ;;  %v837_v10 = vand.u32 4294901760, %v836_v47  ;;  %3784 = vst [vmem:[#allocation16_spill] sm:$0xff] %v2951_v56  ;;  %v2955_v47 = vand.u32 4294901760, %v2925_v59 }
  0xc8   : > { %v2933_v25 = vsub.f32 %v610_v0, %v2918_v2  ;;  %3785 = vst [vmem:[#allocation17_spill] sm:$0xff] %v2961_v31 }
  0xc9   : > { %v2945_v44 = vsub.f32 %v613_v41, %v2927_v37  ;;  %731 = vmatpush.msra.mxu0 %v2927_v37  ;;  %2324 = vmatpush.msra.mxu2 %v2927_v37 }
  0xca   : > { %838 = vmatpush.msra.mxu1 %v837_v10  ;;  %2331 = vmatpush.msra.mxu3 %v837_v10  ;;  %v695_v10 = vsel %vm687_vm0, %v633_v4, 0  ;;  %v3786_v24 = vand.u32 4294901760, %v2933_v25 }
  0xcb   : > { %733 = vmatpush.msra.mxu0 %v2918_v2  ;;  %2325 = vmatpush.msra.mxu2 %v2918_v2  ;;  %v3747_v41 = vand.u32 4294901760, %v2945_v44  ;;  %v2976_v17 = vand.u32 4294901760, %v695_v10 }
  0xcc   : > { %v848_v4 = vsub.f32 %v2933_v25, %v3786_v24  ;;  %v3788_v24 = vand.u32 4294901760, %v2936_v21 }
  0xcd   : > { %735 = vmatpush.msra.mxu0 %v2913_v27  ;;  %2326 = vmatpush.msra.mxu2 %v2913_v27  ;;  %v842_v0 = vsub.f32 %v2945_v44, %v3747_v41  ;;  %v747_v41 = vsub.f32 %v2925_v59, %v2955_v47 }
  0xce   : > { %741 = vmatmul.f32.vlgmr.msra.gmra.mxu0 %v2949_v63  ;;  %773 = vmatmul.f32.vlgmr.msra.gmra.mxu2 %v2951_v56  ;;  %v779_v56 = vsub.f32 %v2930_v38, %v2961_v31  ;;  %v605_v63 = vadd.f32 %v2728_v19, %v2723_v13  ;;  %v854_v61 = vsub.f32 %v2936_v21, %v3788_v24  ;;  %v3790_v19 = vand.u32 4294901760, %v2797_v54 }
  0xcf   : > { %900 = vmatpush.msrb.mxu2 %v2745_v30  ;;  %1047 = vmatpush.msrb.mxu0 %v3787_v34  ;;  %v843_v1 = vand.u32 4294901760, %v842_v0  ;;  %v849_v30 = vand.u32 4294901760, %v848_v4  ;;  %v2996_v0 = vsub.f32 %v695_v10, %v2976_v17  ;;  %v2999_v34 = vsub.f32 %v707_v16, %v2978_v43 }
  0xd0   : > { %v421_v13 = vmul.f32 %v2679_v45, %v2726_v18  ;;  %v3006_v24 = vand.u32 4294901760, %v747_v41  ;;  %v629_v10 = vmax.f32 %v605_v63, 0.0  ;;  %v3018_v18 = vadd.f32 %v2751_v33, %v2720_v11 }
  0xd1   : > { %903 = vmatpush.msrb.mxu2 %v2769_v51  ;;  %1051 = vmatpush.msrb.mxu0 %v3789_v15  ;;  %v3008_v51 = vand.u32 4294901760, %v779_v56  ;;  %v634_v15 = vld [vmem:[%s3729_s5 + $0x18] sm:$0xff]  ;;  %v855_v56 = vand.u32 4294901760, %v854_v61  ;;  %v500_v41 = vmul.f32 %v2681_v46, %v2696_v55  ;;  %v497_v16 = vmul.f32 %v2681_v46, %v2701_v60 }
  0xd2   : > { %844 = vmatpush.msra.mxu1 %v843_v1  ;;  %2332 = vmatpush.msra.mxu3 %v843_v1  ;;  %v638_v1 = vld [vmem:[%s3729_s5 + $0x38] sm:$0xff]  ;;  %v3028_v4 = vadd.f32 %v2775_v49, %v2692_v53  ;;  %v3791_v11 = vand.u32 4294901760, %v2838_v42  ;;  %v3037_v33 = vand.u32 4294901760, %v2999_v34  ;;  %v698_v55 = vsel %vm687_vm0, %v634_v15, 0 }
  0xd3   : > { %906 = vmatpush.msrb.mxu2 %v2797_v54  ;;  %1055 = vmatpush.msrb.mxu0 %v3790_v19  ;;  %v418_v54 = vmul.f32 %v2679_v45, %v2749_v32  ;;  %v3034_v32 = vand.u32 4294901760, %v2996_v0  ;;  %v710_v60 = vsel %vm687_vm0, %v638_v1, 0  ;;  %v524_v61 = vadd.f32 %v500_v41, %v421_v13 }
  0xd4   : > { %850 = vmatpush.msra.mxu1 %v849_v30  ;;  %2333 = vmatpush.msra.mxu3 %v849_v30  ;;  %3792 = vst [vmem:[#allocation18_spill] sm:$0xff] %v3037_v33  ;;  %v3043_v53 = vand.u32 4294901760, %v629_v10  ;;  %v626_v49 = vmax.f32 %v3018_v18, 0.0  ;;  %v415_v63 = vmul.f32 %v2679_v45, %v2773_v39  ;;  %v3055_v13 = vand.u32 4294901760, %v698_v55 }
  0xd5   : > { %909 = vmatpush.msrb.mxu2 %v2838_v42  ;;  %1059 = vmatpush.msrb.mxu0 %v3791_v11  ;;  %v521_v42 = vadd.f32 %v497_v16, %v418_v54  ;;  %v3051_v30 = vadd.f32 %v2803_v9, %v524_v61  ;;  %v3057_v19 = vand.u32 4294901760, %v710_v60  ;;  %v494_v15 = vmul.f32 %v2681_v46, %v2711_v5 }
  0xd6   : > { %856 = vmatpush.msra.mxu1 %v855_v56  ;;  %2334 = vmatpush.msra.mxu3 %v855_v56  ;;  %v623_v1 = vmax.f32 %v3028_v4, 0.0  ;;  %v3793_v18 = vand.u32 4294901760, %v2892_v7  ;;  %v755_v39 = vsub.f32 %v2996_v0, %v3034_v32  ;;  %v787_v9 = vsub.f32 %v2999_v34, %v3037_v33 }
  0xd7   : > { %749 = vmatmul.f32.gmra.mxu0 %v3006_v24  ;;  %781 = vmatmul.f32.gmra.mxu2 %v3008_v51  ;;  %v412_v54 = vmul.f32 %v2679_v45, %v2801_v8  ;;  %v593_v56 = vadd.f32 %v2844_v52, %v521_v42  ;;  %v409_v5 = vmul.f32 %v2679_v45, %v2842_v50  ;;  %v3081_v41 = vand.u32 4294901760, %v626_v49 }
  0xd8   : > { %858 = vmatmul.f32.vlgmr.msra.gmra.mxu1 %v2850_v57  ;;  %874 = vmatmul.f32.vlgmr.msra.gmra.mxu3 %v2852_v62  ;;  %v488_v8 = vmul.f32 %v2681_v46, %v2807_v12  ;;  %v3794_v52 = vand.u32 4294901760, %v2945_v44  ;;  %v620_v45 = vmax.f32 %v3051_v30, 0.0  ;;  %v518_v50 = vadd.f32 %v494_v15, %v415_v63 }
  0xd9   : > { %912 = vmatpush.msrb.mxu2 %v2892_v7  ;;  %972 = vmatpush.msrb.mxu3 %v2742_v29  ;;  %v491_v7 = vmul.f32 %v2681_v46, %v2730_v20  ;;  %v3095_v20 = vsub.f32 %v710_v60, %v3057_v19  ;;  %v3097_v16 = vand.u32 4294901760, %v623_v1  ;;  %v3796_v46 = vand.u32 4294901760, %v2933_v25 }
  0xda   : > { %1063 = vmatpush.msrb.mxu0 %v3793_v18  ;;  %1118 = vmatpush.msrb.mxu1 %v2742_v29  ;;  %v3077_v29 = vsub.f32 %v629_v10, %v3043_v53  ;;  %v3092_v10 = vsub.f32 %v698_v55, %v3055_v13  ;;  %v3104_v12 = vand.u32 4294901760, %v787_v9  ;;  %v512_v4 = vadd.f32 %v488_v8, %v409_v5 }
  0xdb   : > { %915 = vmatpush.msrb.mxu2 %v2945_v44  ;;  %974 = vmatpush.msrb.mxu3 %v2766_v48  ;;  %3795 = vst [vmem:[#allocation19_spill] sm:$0xff] %v3095_v20  ;;  %v617_v44 = vmax.f32 %v593_v56, 0.0  ;;  %v590_v11 = vadd.f32 %v2898_v6, %v518_v50  ;;  %v515_v55 = vadd.f32 %v491_v7, %v412_v54  ;;  %v3798_v60 = vand.u32 4294901760, %v2936_v21 }
  0xdc   : > { %1067 = vmatpush.msrb.mxu0 %v3794_v52  ;;  %1120 = vmatpush.msrb.mxu1 %v2766_v48  ;;  %v3102_v48 = vand.u32 4294901760, %v755_v39  ;;  %3797 = vst [vmem:[#allocation20_spill] sm:$0xff] %v3104_v12  ;;  %v3116_v61 = vand.u32 4294901760, %v620_v45  ;;  %v3122_v63 = vand.u32 4294901760, %v3092_v10  ;;  %v3135_v15 = vsub.f32 %v623_v1, %v3097_v16 }
  0xdd   : > { %918 = vmatpush.msrb.mxu2 %v2933_v25  ;;  %976 = vmatpush.msrb.mxu3 %v2794_v3  ;;  %v3757_v25 = vand.u32 4294901760, %v3077_v29  ;;  %v587_v42 = vadd.f32 %v2896_v35, %v515_v55  ;;  %v614_v30 = vmax.f32 %v590_v11, 0.0 }
  0xde   : > { %1071 = vmatpush.msrb.mxu0 %v3796_v46  ;;  %1122 = vmatpush.msrb.mxu1 %v2794_v3  ;;  %v3113_v3 = vsub.f32 %v626_v49, %v3081_v41  ;;  %v584_v49 = vadd.f32 %v2866_v14, %v512_v4  ;;  %v3146_v54 = vsub.f32 %v620_v45, %v3116_v61  ;;  %v3754_v8 = vand.u32 4294901760, %v3135_v15 }
  0xdf   : > { %921 = vmatpush.msrb.mxu2 %v2936_v21  ;;  %978 = vmatpush.msrb.mxu3 %v2829_v28  ;;  %v3125_v21 = vand.u32 4294901760, %v3095_v20  ;;  %v1266_v18 = vsub.f32 %v3077_v29, %v3757_v25  ;;  %v611_v9 = vmax.f32 %v587_v42, 0.0  ;;  %v763_v1 = vsub.f32 %v3092_v10, %v3122_v63 }
  0xe0   : > { %1075 = vmatpush.msrb.mxu0 %v3798_v60  ;;  %1124 = vmatpush.msrb.mxu1 %v2829_v28  ;;  %v3129_v28 = vand.u32 4294901760, %v617_v44  ;;  %v3755_v39 = vand.u32 4294901760, %v3113_v3  ;;  %v608_v56 = vmax.f32 %v584_v49, 0.0  ;;  %v3154_v5 = vand.u32 4294901760, %v614_v30 }
  0xe1   : > { %1175 = vmatpush.msra.mxu2 %v3043_v53  ;;  %3799 = vst [vmem:[#allocation21_spill] sm:$0xff] %v3125_v21  ;;  %757 = vmatmul.f32.gmra.mxu0 %v3102_v48  ;;  %v1267_v52 = vand.u32 4294901760, %v1266_v18  ;;  %v3167_v45 = vand.u32 4294901760, %v611_v9  ;;  %v3171_v50 = vand.u32 4294901760, %v763_v1  ;;  %v1278_v4 = vsub.f32 %v3135_v15, %v3754_v8 }
  0xe2   : > { %1354 = vmatpush.msra.mxu0 %v3077_v29  ;;  %789 = vmatmul.f32.gmra.mxu2 %v3104_v12  ;;  %v3159_v7 = vsub.f32 %v617_v44, %v3129_v28  ;;  %v3753_v44 = vand.u32 4294901760, %v3146_v54  ;;  %v3185_v11 = vand.u32 4294901760, %v608_v56  ;;  %v630_v60 = vmax.f32 %v2736_v23, 0.0 }
  0xe3   : > { %862 = vmatmul.f32.gmra.mxu1 %v2907_v22  ;;  %878 = vmatmul.f32.gmra.mxu3 %v2911_v26  ;;  %v3194_v42 = vsub.f32 %v611_v9, %v3167_v45  ;;  %v1279_v23 = vand.u32 4294901760, %v1278_v4  ;;  %v3801_v4 = vld [vmem:[#allocation7_spill] sm:$0xff] }
  0xe4   : > { %980 = vmatpush.msrb.mxu3 %v2887_v40  ;;  %1126 = vmatpush.msrb.mxu1 %v2887_v40  ;;  %v795_v40 = vsub.f32 %v3095_v20, %v3125_v21  ;;  %v3752_v55 = vand.u32 4294901760, %v3159_v7  ;;  %v1284_v49 = vsub.f32 %v3146_v54, %v3753_v44  ;;  %v3204_v18 = vsub.f32 %v608_v56, %v3185_v11 }
  0xe5   : > { %1177 = vmatpush.msra.mxu2 %v3081_v41  ;;  %1357 = vmatpush.msra.mxu0 %v3113_v3  ;;  %v3758_v56 = vand.u32 4294901760, %v3194_v42 }
  0xe6   : > { %982 = vmatpush.msrb.mxu3 %v2927_v37  ;;  %1128 = vmatpush.msrb.mxu1 %v2927_v37  ;;  %v1272_v37 = vsub.f32 %v3113_v3, %v3755_v39  ;;  %v3173_v46 = vand.u32 4294901760, %v795_v40  ;;  %v1290_v9 = vsub.f32 %v3159_v7, %v3752_v55  ;;  %v3210_v40 = vand.u32 4294901760, %v630_v60  ;;  %v3802_v55 = vld [vmem:[#allocation6_spill] sm:$0xff]  ;;  %v3804_v39 = vld [vmem:[#allocation8_spill] sm:$0xff] }
  0xe7   : > { %1179 = vmatpush.msra.mxu2 %v3097_v16  ;;  %1360 = vmatpush.msra.mxu0 %v3135_v15 }
  0xe8   : > { %984 = vmatpush.msrb.mxu3 %v2918_v2  ;;  %1130 = vmatpush.msrb.mxu1 %v2918_v2  ;;  %3800 = vst [vmem:[#allocation22_spill] sm:$0xff] %v3173_v46  ;;  %v3180_v2 = vsub.f32 %v614_v30, %v3154_v5  ;;  %v627_v30 = vmax.f32 %v2757_v36, 0.0  ;;  %v624_v36 = vmax.f32 %v2782_v58, 0.0  ;;  %v591_v58 = vadd.f32 %v2898_v6, %v3802_v55  ;;  %v3803_v6 = vld [vmem:[#allocation9_spill] sm:$0xff] }
  0xe9   : > { %1181 = vmatpush.msra.mxu2 %v3116_v61  ;;  %1363 = vmatpush.msra.mxu0 %v3146_v54  ;;  %v1291_v44 = vand.u32 4294901760, %v1290_v9  ;;  %v3230_v8 = vsub.f32 %v630_v60, %v3210_v40  ;;  %v618_v55 = vmax.f32 %v3803_v6, 0.0  ;;  %v588_v9 = vadd.f32 %v2896_v35, %v3804_v39  ;;  %v3806_v6 = vld [vmem:[#allocation10_spill] sm:$0xff] }
  0xea   : > { %986 = vmatpush.msrb.mxu3 %v2913_v27  ;;  %1132 = vmatpush.msrb.mxu1 %v2913_v27  ;;  %v1273_v27 = vand.u32 4294901760, %v1272_v37  ;;  %v3756_v1 = vand.u32 4294901760, %v3180_v2  ;;  %v3217_v37 = vand.u32 4294901760, %v627_v30  ;;  %v615_v35 = vmax.f32 %v591_v58, 0.0 }
  0xeb   : > { %1183 = vmatpush.msra.mxu2 %v3129_v28  ;;  %1366 = vmatpush.msra.mxu0 %v3159_v7  ;;  %v3264_v58 = vand.u32 4294901760, %v618_v55 }
  0xec   : > { %1268 = vmatpush.msra.mxu3 %v1267_v52  ;;  %1426 = vmatpush.msra.mxu1 %v3043_v53  ;;  %v1285_v52 = vand.u32 4294901760, %v1284_v49  ;;  %v1296_v49 = vsub.f32 %v3180_v2, %v3756_v1  ;;  %v1302_v1 = vsub.f32 %v3194_v42, %v3758_v56  ;;  %v3244_v60 = vsub.f32 %v627_v30, %v3217_v37 }
  0xed   : > { %765 = vmatmul.f32.gmra.mxu0 %v3171_v50  ;;  %797 = vmatmul.f32.gmra.mxu2 %v3173_v46  ;;  %v3808_v46 = vand.u32 4294901760, %v3077_v29 }
  0xee   : > { %866 = vmatmul.f32.gmra.mxu1 %v2976_v17  ;;  %882 = vmatmul.f32.gmra.mxu3 %v2978_v43  ;;  %v1297_v39 = vand.u32 4294901760, %v1296_v49  ;;  %v1303_v49 = vand.u32 4294901760, %v1302_v1  ;;  %v3763_v29 = vand.u32 4294901760, %v3244_v60 }
  0xef   : > { %1185 = vmatpush.msra.mxu2 %v3154_v5  ;;  %1274 = vmatpush.msra.mxu3 %v1273_v27  ;;  %v621_v27 = vmax.f32 %v3801_v4, 0.0  ;;  %v3232_v4 = vand.u32 4294901760, %v624_v36 }
  0xf0   : > { %1369 = vmatpush.msra.mxu0 %v3180_v2  ;;  %1428 = vmatpush.msra.mxu1 %v3081_v41 }
  0xf1   : > { %1187 = vmatpush.msra.mxu2 %v3167_v45  ;;  %1280 = vmatpush.msra.mxu3 %v1279_v23  ;;  %v3246_v25 = vand.u32 4294901760, %v621_v27  ;;  %v585_v23 = vadd.f32 %v2866_v14, %v3806_v6  ;;  %v3258_v56 = vsub.f32 %v624_v36, %v3232_v4  ;;  %v3764_v14 = vand.u32 4294901760, %v3230_v8 }
  0xf2   : > { %1372 = vmatpush.msra.mxu0 %v3194_v42  ;;  %1430 = vmatpush.msra.mxu1 %v3097_v16  ;;  %v612_v6 = vmax.f32 %v588_v9, 0.0  ;;  %v3809_v36 = vand.u32 4294901760, %v3113_v3 }
  0xf3   : > { %1189 = vmatpush.msra.mxu2 %v3185_v11  ;;  %1286 = vmatpush.msra.mxu3 %v1285_v52  ;;  %v3805_v52 = vld [vmem:[#allocation11_spill] sm:$0xff]  ;;  %v3268_v12 = vsub.f32 %v621_v27, %v3246_v25  ;;  %v1720_v3 = vsub.f32 %v3230_v8, %v3764_v14  ;;  %v3765_v1 = vand.u32 4294901760, %v3258_v56  ;;  %v3285_v27 = vsub.f32 %v618_v55, %v3264_v58  ;;  %v3812_v55 = vld [vmem:[#allocation13_spill] sm:$0xff] }
  0xf4   : > { %1375 = vmatpush.msra.mxu0 %v3204_v18  ;;  %1432 = vmatpush.msra.mxu1 %v3116_v61 }
  0xf5   : > { %1292 = vmatpush.msra.mxu3 %v1291_v44  ;;  %924 = vmatmul.f32.vlgmr.msrb.gmra.mxu2 %v3805_v52  ;;  %v3807_v44 = vand.u32 4294901760, %v3204_v18 }
  0xf6   : > { %1434 = vmatpush.msra.mxu1 %v3129_v28  ;;  %886 = vmatmul.f32.gmra.mxu3 %v3057_v19 }
  0xf7   : > { %870 = vmatmul.f32.gmra.mxu1 %v3055_v13  ;;  %1077 = vmatmul.f32.vlgmr.msrb.gmra.mxu0 %v2850_v57  ;;  %v1308_v30 = vsub.f32 %v3204_v18, %v3807_v44  ;;  %v3274_v44 = vand.u32 4294901760, %v615_v35 }
  0xf8   : > { %1501 = vmatpush.msrb.mxu2 %v3808_v46  ;;  %1629 = vmatpush.msrb.mxu0 %v3210_v40  ;;  %v609_v46 = vmax.f32 %v585_v23, 0.0  ;;  %v3287_v23 = vand.u32 4294901760, %v612_v6 }
  0xf9   : > { %1298 = vmatpush.msra.mxu3 %v1297_v39  ;;  %1436 = vmatpush.msra.mxu1 %v3154_v5  ;;  %v1309_v9 = vand.u32 4294901760, %v1308_v30  ;;  %v3810_v39 = vand.u32 4294901760, %v3135_v15  ;;  %v3811_v30 = vand.u32 4294901760, %v3146_v54  ;;  %v1726_v15 = vsub.f32 %v3244_v60, %v3763_v29 }
  0xfa   : > { %1505 = vmatpush.msrb.mxu2 %v3809_v36  ;;  %1631 = vmatpush.msrb.mxu0 %v3217_v37  ;;  %v3298_v36 = vsub.f32 %v615_v35, %v3274_v44  ;;  %v1721_v54 = vand.u32 4294901760, %v1720_v3  ;;  %v3813_v35 = vand.u32 4294901760, %v3159_v7  ;;  %v1743_v29 = vand.u32 4294901760, %v3285_v27 }
  0xfb   : > { %1304 = vmatpush.msra.mxu3 %v1303_v49  ;;  %1438 = vmatpush.msra.mxu1 %v3167_v45  ;;  %v1737_v49 = vand.u32 4294901760, %v3268_v12  ;;  %v1727_v14 = vand.u32 4294901760, %v1726_v15  ;;  %v3815_v15 = vand.u32 4294901760, %v3194_v42 }
  0xfc   : > { %1509 = vmatpush.msrb.mxu2 %v3810_v39  ;;  %1633 = vmatpush.msrb.mxu0 %v3232_v4  ;;  %v1732_v39 = vsub.f32 %v3258_v56, %v3765_v1  ;;  %v3814_v1 = vand.u32 4294901760, %v3180_v2  ;;  %v1749_v7 = vand.u32 4294901760, %v3298_v36  ;;  %v1744_v2 = vsub.f32 %v3285_v27, %v1743_v29 }
  0xfd   : > { %1310 = vmatpush.msra.mxu3 %v1309_v9  ;;  %1440 = vmatpush.msra.mxu1 %v3185_v11  ;;  %v3302_v9 = vand.u32 4294901760, %v609_v46  ;;  %v1738_v3 = vsub.f32 %v3268_v12, %v1737_v49 }
  0xfe   : > { %1513 = vmatpush.msrb.mxu2 %v3811_v30  ;;  %1635 = vmatpush.msrb.mxu0 %v3246_v25  ;;  %v3310_v30 = vsub.f32 %v612_v6, %v3287_v23  ;;  %v1750_v42 = vsub.f32 %v3298_v36, %v1749_v7 }
  0xff   : > { %929 = vmatmul.f32.gmra.mxu2 %v2925_v59  ;;  %990 = vmatmul.f32.vlgmr.msrb.gmra.mxu3 %v3812_v55  ;;  %v3325_v6 = vsub.f32 %v609_v46, %v3302_v9  ;;  %v1739_v46 = vand.u32 4294901760, %v1738_v3  ;;  %v3821_v3 = vand.u32 4294901760, %v3244_v60 }
 0x100   : > { %1081 = vmatmul.f32.gmra.mxu0 %v2907_v22  ;;  %1134 = vmatmul.f32.vlgmr.msrb.gmra.mxu1 %v2850_v57 }
 0x101   : > { %1517 = vmatpush.msrb.mxu2 %v3813_v35  ;;  %1572 = vmatpush.msrb.mxu3 %v3043_v53  ;;  %v1733_v53 = vand.u32 4294901760, %v1732_v39 }
 0x102   : > { %1637 = vmatpush.msrb.mxu0 %v3264_v58  ;;  %1722 = vmatpush.msrb.mxu1 %v1721_v54 }
 0x103   : > { %1521 = vmatpush.msrb.mxu2 %v3814_v1  ;;  %1574 = vmatpush.msrb.mxu3 %v3081_v41  ;;  %v1755_v41 = vand.u32 4294901760, %v3310_v30  ;;  %v3816_v1 = vand.u32 4294901760, %v3204_v18 }
 0x104   : > { %1639 = vmatpush.msrb.mxu0 %v3274_v44  ;;  %1728 = vmatpush.msrb.mxu1 %v1727_v14  ;;  %v1745_v14 = vand.u32 4294901760, %v1744_v2 }
 0x105   : > { %1525 = vmatpush.msrb.mxu2 %v3815_v15  ;;  %1576 = vmatpush.msrb.mxu3 %v3097_v16  ;;  %v1761_v16 = vand.u32 4294901760, %v3325_v6  ;;  %v1756_v18 = vsub.f32 %v3310_v30, %v1755_v41  ;;  %v3825_v15 = vld [vmem:[#allocation22_spill] sm:$0xff] }
 0x106   : > { %1641 = vmatpush.msrb.mxu0 %v3287_v23  ;;  %1734 = vmatpush.msrb.mxu1 %v1733_v53  ;;  %v3822_v53 = vand.u32 4294901760, %v3258_v56 }
 0x107   : > { %1529 = vmatpush.msrb.mxu2 %v3816_v1  ;;  %1578 = vmatpush.msrb.mxu3 %v3116_v61  ;;  %v1751_v61 = vand.u32 4294901760, %v1750_v42  ;;  %v1762_v54 = vsub.f32 %v3325_v6, %v1761_v16  ;;  %v1757_v39 = vand.u32 4294901760, %v1756_v18  ;;  %v3472_v42 = vpop.permute.xlu1 %654 }
 0x108   : > { %1643 = vmatpush.msrb.mxu0 %v3302_v9  ;;  %1740 = vmatpush.msrb.mxu1 %v1739_v46 }
 0x109   : > { %934 = vmatmul.f32.gmra.mxu2 %v2996_v0  ;;  %996 = vmatmul.f32.gmra.mxu3 %v2955_v47  ;;  %v1763_v35 = vand.u32 4294901760, %v1762_v54 }
 0x10a   : > { %1085 = vmatmul.f32.gmra.mxu0 %v2976_v17  ;;  %1138 = vmatmul.f32.gmra.mxu1 %v2907_v22 }
 0x10b   : > { %1580 = vmatpush.msrb.mxu3 %v3129_v28  ;;  %1746 = vmatpush.msrb.mxu1 %v1745_v14  ;;  %v3817_v28 = vld [vmem:[#allocation12_spill] sm:$0xff]  ;;  %v3479_v14 = vpop.permute.xlu2 %659 }
 0x10d   : > { %1582 = vmatpush.msrb.mxu3 %v3154_v5  ;;  %1752 = vmatpush.msrb.mxu1 %v1751_v61  ;;  %v3818_v5 = vld [vmem:[#allocation14_spill] sm:$0xff] }
 0x10f   : > { %1584 = vmatpush.msrb.mxu3 %v3167_v45  ;;  %1758 = vmatpush.msrb.mxu1 %v1757_v39  ;;  %v3819_v45 = vld [vmem:[#allocation15_spill] sm:$0xff] }
 0x111   : > { %1586 = vmatpush.msrb.mxu3 %v3185_v11  ;;  %1764 = vmatpush.msrb.mxu1 %v1763_v35  ;;  %v3820_v11 = vand.u32 4294901760, %v3230_v8 }
 0x112   : > { %939 = vmatmul.f32.gmra.mxu2 %v3092_v10  ;;  %1002 = vmatmul.f32.gmra.mxu3 %v3034_v32 }
 0x113   : > { %1089 = vmatmul.f32.gmra.mxu0 %v3055_v13  ;;  %1142 = vmatmul.f32.gmra.mxu1 %v2976_v17 }
 0x11a   : > { %944 = vmatmul.f32.gmra.mxu2 %v3817_v28  ;;  %1008 = vmatmul.f32.gmra.mxu3 %v3122_v63 }
 0x11b   : > { %1093 = vmatmul.f32.gmra.mxu0 %v2852_v62  ;;  %1146 = vmatmul.f32.gmra.mxu1 %v3055_v13 }
 0x122   : > { %949 = vmatmul.f32.gmra.mxu2 %v2930_v38  ;;  %1014 = vmatmul.f32.gmra.mxu3 %v3818_v5 }
 0x123   : > { %1097 = vmatmul.f32.gmra.mxu0 %v2911_v26  ;;  %1150 = vmatmul.f32.gmra.mxu1 %v2852_v62 }
 0x12a   : > { %954 = vmatmul.f32.gmra.mxu2 %v2999_v34  ;;  %1020 = vmatmul.f32.gmra.mxu3 %v2961_v31 }
 0x12b   : > { %1101 = vmatmul.f32.gmra.mxu0 %v2978_v43  ;;  %1154 = vmatmul.f32.gmra.mxu1 %v2911_v26 }
 0x132   : > { %959 = vmatmul.f32.gmra.mxu2 %v3095_v20  ;;  %1026 = vmatmul.f32.gmra.mxu3 %v3037_v33 }
 0x133   : > { %1105 = vmatmul.f32.gmra.mxu0 %v3057_v19  ;;  %1158 = vmatmul.f32.gmra.mxu1 %v2978_v43 }
 0x13a   : > { %1032 = vmatmul.f32.gmra.mxu3 %v3125_v21  ;;  %1195 = vmatmul.f32.vlgmr.msra.gmra.mxu2 %v3819_v45 }
 0x13b   : > { %1162 = vmatmul.f32.gmra.mxu1 %v3057_v19  ;;  %1378 = vmatmul.f32.vlgmr.msra.gmra.mxu0 %v3805_v52 }
 0x13c   : > { %1808 = vmatpush.msra.mxu2 %v3230_v8  ;;  %1955 = vmatpush.msra.mxu0 %v3820_v11 }
 0x13e   : > { %1811 = vmatpush.msra.mxu2 %v3244_v60  ;;  %1959 = vmatpush.msra.mxu0 %v3821_v3 }
 0x140   : > { %1814 = vmatpush.msra.mxu2 %v3258_v56  ;;  %1963 = vmatpush.msra.mxu0 %v3822_v53 }
 0x142   : > { %1817 = vmatpush.msra.mxu2 %v3268_v12  ;;  %1967 = vmatpush.msra.mxu0 %v1737_v49  ;;  %v3824_v49 = vld [vmem:[#allocation20_spill] sm:$0xff] }
 0x143   : > { %1203 = vmatmul.f32.gmra.mxu2 %v3006_v24  ;;  %1312 = vmatmul.f32.vlgmr.msra.gmra.mxu3 %v2850_v57 }
 0x144   : > { %1383 = vmatmul.f32.gmra.mxu0 %v2925_v59  ;;  %1444 = vmatmul.f32.vlgmr.msra.gmra.mxu1 %v3812_v55 }
 0x145   : > { %1820 = vmatpush.msra.mxu2 %v3285_v27  ;;  %1880 = vmatpush.msra.mxu3 %v3210_v40 }
 0x146   : > { %1971 = vmatpush.msra.mxu0 %v1743_v29  ;;  %2026 = vmatpush.msra.mxu1 %v3210_v40 }
 0x147   : > { %1823 = vmatpush.msra.mxu2 %v3298_v36  ;;  %1882 = vmatpush.msra.mxu3 %v3217_v37 }
 0x148   : > { %1975 = vmatpush.msra.mxu0 %v1749_v7  ;;  %2028 = vmatpush.msra.mxu1 %v3217_v37 }
 0x149   : > { %1826 = vmatpush.msra.mxu2 %v3310_v30  ;;  %1884 = vmatpush.msra.mxu3 %v3232_v4 }
 0x14a   : > { %1979 = vmatpush.msra.mxu0 %v1755_v41  ;;  %2030 = vmatpush.msra.mxu1 %v3232_v4  ;;  %v3823_v4 = vld [vmem:[#allocation16_spill] sm:$0xff] }
 0x14b   : > { %1829 = vmatpush.msra.mxu2 %v3325_v6  ;;  %1886 = vmatpush.msra.mxu3 %v3246_v25  ;;  %v742_v12 = vpop.f32.mrf.mxu0  ;;  %v3464_v6 = vpop.permute.xlu0 %649 }
 0x14c   : > { %1983 = vmatpush.msra.mxu0 %v1761_v16  ;;  %2032 = vmatpush.msra.mxu1 %v3246_v25  ;;  %v743_v16 = vadd.f32 %v742_v12, %v3464_v6  ;;  %v3488_v12 = vpop.permute.xlu1 %669 }
 0x14d   : > { %1211 = vmatmul.f32.gmra.mxu2 %v3102_v48  ;;  %1316 = vmatmul.f32.gmra.mxu3 %v2907_v22 }
 0x14e   : > { %1388 = vmatmul.f32.gmra.mxu0 %v2996_v0  ;;  %1450 = vmatmul.f32.gmra.mxu1 %v2955_v47 }
 0x14f   : > { %1888 = vmatpush.msra.mxu3 %v3264_v58  ;;  %2034 = vmatpush.msra.mxu1 %v3264_v58 }
 0x151   : > { %1890 = vmatpush.msra.mxu3 %v3274_v44  ;;  %2036 = vmatpush.msra.mxu1 %v3274_v44  ;;  %v3426_v8 = vpop.f32.mrf.mxu2 }
 0x153   : > { %1892 = vmatpush.msra.mxu3 %v3287_v23  ;;  %2038 = vmatpush.msra.mxu1 %v3287_v23  ;;  %v3481_v18 = vpop.permute.xlu0 %664 }
 0x154   : > { %v750_v25 = vpop.f32.mrf.mxu0 }
 0x155   : > { %1894 = vmatpush.msra.mxu3 %v3302_v9  ;;  %2040 = vmatpush.msra.mxu1 %v3302_v9  ;;  %v859_v40 = vpop.f32.mrf.mxu1  ;;  %v751_v3 = vadd.f32 %v750_v25, %v3472_v42 }
 0x156   : > { %1219 = vmatmul.f32.gmra.mxu2 %v3171_v50  ;;  %1320 = vmatmul.f32.gmra.mxu3 %v2976_v17  ;;  %v860_v61 = vadd.f32 %v859_v40, %v743_v16  ;;  %v3490_v16 = vpop.permute.xlu2 %674 }
 0x157   : > { %1393 = vmatmul.f32.gmra.mxu0 %v3092_v10  ;;  %1456 = vmatmul.f32.gmra.mxu1 %v3034_v32 }
 0x15a   : > { %v3436_v56 = vpop.f32.mrf.mxu2 }
 0x15b   : > { %v3438_v37 = vpop.f32.mrf.mxu3 }
 0x15e   : > { %1227 = vmatmul.f32.gmra.mxu2 %v3823_v4  ;;  %1324 = vmatmul.f32.gmra.mxu3 %v3055_v13  ;;  %v758_v60 = vpop.f32.mrf.mxu0 }
 0x15f   : > { %1398 = vmatmul.f32.gmra.mxu0 %v3817_v28  ;;  %1462 = vmatmul.f32.gmra.mxu1 %v3122_v63  ;;  %v759_v25 = vadd.f32 %v758_v60, %v3479_v14 }
 0x160   : > { %v863_v58 = vpop.f32.mrf.mxu1 }
 0x165   : > { %v3446_v29 = vpop.f32.mrf.mxu2 }
 0x166   : > { %1235 = vmatmul.f32.gmra.mxu2 %v3008_v51  ;;  %1328 = vmatmul.f32.gmra.mxu3 %v2852_v62  ;;  %v3450_v44 = vpop.f32.mrf.mxu3 }
 0x167   : > { %1403 = vmatmul.f32.gmra.mxu0 %v2930_v38  ;;  %1468 = vmatmul.f32.gmra.mxu1 %v3818_v5 }
 0x16a   : > { %v3452_v27 = vpop.f32.mrf.mxu0 }
 0x16b   : > { %v867_v23 = vpop.f32.mrf.mxu1 }
 0x16e   : > { %1243 = vmatmul.f32.gmra.mxu2 %v3824_v49  ;;  %1332 = vmatmul.f32.gmra.mxu3 %v2911_v26 }
 0x16f   : > { %1408 = vmatmul.f32.gmra.mxu0 %v2999_v34  ;;  %1474 = vmatmul.f32.gmra.mxu1 %v2961_v31 }
 0x170   : > { %v3458_v36 = vpop.f32.mrf.mxu2 }
 0x171   : > { %v3460_v9 = vpop.f32.mrf.mxu3 }
 0x174   : > { %v3462_v30 = vpop.f32.mrf.mxu1  ;;  %v1078_v7 = vpop.f32.mrf.mxu0 }
 0x176   : > { %1251 = vmatmul.f32.gmra.mxu2 %v3825_v15  ;;  %1336 = vmatmul.f32.gmra.mxu3 %v2978_v43 }
 0x177   : > { %1413 = vmatmul.f32.gmra.mxu0 %v3095_v20  ;;  %1480 = vmatmul.f32.gmra.mxu1 %v3037_v33 }
 0x178   : > { %v925_v2 = vpop.f32.mrf.mxu2 }
 0x179   : > { %v3470_v41 = vpop.f32.mrf.mxu3  ;;  %v926_v35 = vadd.f32 %v925_v2, %v860_v61  ;;  %v3492_v2 = vpop.permute.xlu0 %679 }
 0x17d   : > { %v1082_v46 = vpop.f32.mrf.mxu0  ;;  %v1135_v1 = vpop.f32.mrf.mxu1 }
 0x17e   : > { %1340 = vmatmul.f32.gmra.mxu3 %v3057_v19  ;;  %1531 = vmatmul.f32.vlgmr.msrb.gmra.mxu2 %v2850_v57 }
 0x17f   : > { %1486 = vmatmul.f32.gmra.mxu1 %v3125_v21  ;;  %1649 = vmatmul.f32.vlgmr.msrb.gmra.mxu0 %v3819_v45  ;;  %v864_v21 = vadd.f32 %v863_v58, %v751_v3 }
 0x182   : > { %v930_v54 = vpop.f32.mrf.mxu2  ;;  %v991_v39 = vpop.f32.mrf.mxu3 }
 0x183   : > { %v992_v11 = vadd.f32 %v991_v39, %v926_v35  ;;  %v931_v61 = vadd.f32 %v930_v54, %v864_v21  ;;  %v3499_v21 = vpop.permute.xlu1 %684  ;;  %v868_v54 = vadd.f32 %v867_v23, %v759_v25  ;;  %v767_v23 = vadd.f32 %v3452_v27, %v3481_v18 }
 0x184   : > { %v775_v27 = vadd.f32 %v3426_v8, %v3488_v12 }
 0x185   : > { %v1079_v40 = vadd.f32 %v1078_v7, %v992_v11  ;;  %v872_v25 = vadd.f32 %v3462_v30, %v767_v23 }
 0x186   : > { %1535 = vmatmul.f32.gmra.mxu2 %v2907_v22  ;;  %1588 = vmatmul.f32.vlgmr.msrb.gmra.mxu3 %v2850_v57 }
 0x187   : > { %1657 = vmatmul.f32.gmra.mxu0 %v3006_v24  ;;  %1766 = vmatmul.f32.vlgmr.msrb.gmra.mxu1 %v2850_v57  ;;  %v1086_v45 = vpop.f32.mrf.mxu0  ;;  %v1139_v53 = vpop.f32.mrf.mxu1  ;;  %v1136_v33 = vadd.f32 %v1135_v1, %v1079_v40 }
 0x188   : > { %v3501_v40 = vpop.permute.xlu2 %2108 }
 0x189   : > { %v2074_v11 = vmax.f32 %v1136_v33, 0.0 }
 0x18c   : > { %v935_v39 = vpop.f32.mrf.mxu2  ;;  %v997_v35 = vpop.f32.mrf.mxu3 }
 0x18d   : > { %v998_v20 = vadd.f32 %v997_v35, %v931_v61  ;;  %v3503_v61 = vpop.permute.xlu0 %2113  ;;  %v936_v35 = vadd.f32 %v935_v39, %v868_v54 }
 0x18e   : > { %1539 = vmatmul.f32.gmra.mxu2 %v2976_v17  ;;  %1592 = vmatmul.f32.gmra.mxu3 %v2907_v22  ;;  %3826 = vst [vmem:[#allocation7_spill] sm:$0xff] %v3503_v61 }
 0x18f   : > { %1665 = vmatmul.f32.gmra.mxu0 %v3102_v48  ;;  %1770 = vmatmul.f32.gmra.mxu1 %v2907_v22  ;;  %v1083_v24 = vadd.f32 %v1082_v46, %v998_v20  ;;  %v2146_v48 = vmul.f32 %v3501_v40, %v2074_v11 }
 0x190   : > { %v1090_v58 = vpop.f32.mrf.mxu0  ;;  %v1143_v7 = vpop.f32.mrf.mxu1 }
 0x191   : > { %v1140_v3 = vadd.f32 %v1139_v53, %v1083_v24 }
 0x193   : > { %v2077_v1 = vmax.f32 %v1140_v3, 0.0  ;;  %v3514_v3 = vpop.permute.xlu1 %2118 }
 0x195   : > { %v2149_v31 = vmul.f32 %v3503_v61, %v2077_v1  ;;  %v940_v20 = vpop.f32.mrf.mxu2  ;;  %v1003_v46 = vpop.f32.mrf.mxu3 }
 0x196   : > { %1543 = vmatmul.f32.gmra.mxu2 %v3055_v13  ;;  %1596 = vmatmul.f32.gmra.mxu3 %v2976_v17  ;;  %v1004_v33 = vadd.f32 %v1003_v46, %v936_v35  ;;  %v941_v54 = vadd.f32 %v940_v20, %v872_v25  ;;  %v876_v20 = vadd.f32 %v3438_v37, %v775_v27 }
 0x197   : > { %v2170_v60 = vadd.f32 %v2149_v31, %v2146_v48  ;;  %1673 = vmatmul.f32.gmra.mxu0 %v3171_v50  ;;  %1774 = vmatmul.f32.gmra.mxu1 %v2976_v17  ;;  %v783_v37 = vadd.f32 %v3436_v56, %v3490_v16 }
 0x198   : > { %v1087_v53 = vadd.f32 %v1086_v45, %v1004_v33  ;;  %v1094_v39 = vpop.f32.mrf.mxu0  ;;  %v1147_v24 = vpop.f32.mrf.mxu1 }
 0x199   : > { %v3524_v33 = vpop.permute.xlu2 %2123 }
 0x19a   : > { %v1144_v11 = vadd.f32 %v1143_v7, %v1087_v53 }
 0x19c   : > { %v2080_v1 = vmax.f32 %v1144_v11, 0.0 }
 0x19d   : > { %v945_v61 = vpop.f32.mrf.mxu2  ;;  %v1009_v35 = vpop.f32.mrf.mxu3 }
 0x19e   : > { %v2152_v31 = vmul.f32 %v3514_v3, %v2080_v1  ;;  %1547 = vmatmul.f32.gmra.mxu2 %v2852_v62  ;;  %1600 = vmatmul.f32.gmra.mxu3 %v3055_v13  ;;  %v1010_v50 = vadd.f32 %v1009_v35, %v941_v54  ;;  %v946_v23 = vadd.f32 %v945_v61, %v876_v20  ;;  %v3534_v35 = vpop.permute.xlu0 %2128 }
 0x19f   : > { %1681 = vmatmul.f32.gmra.mxu0 %v3823_v4  ;;  %1778 = vmatmul.f32.gmra.mxu1 %v3055_v13  ;;  %v880_v54 = vadd.f32 %v3450_v44, %v783_v37  ;;  %v791_v44 = vadd.f32 %v3446_v29, %v3492_v2 }
 0x1a0   : > { %v2171_v30 = vadd.f32 %v2170_v60, %v2152_v31  ;;  %v1091_v45 = vadd.f32 %v1090_v58, %v1010_v50  ;;  %v1098_v7 = vpop.f32.mrf.mxu0  ;;  %v1151_v48 = vpop.f32.mrf.mxu1 }
 0x1a2   : > { %v1148_v46 = vadd.f32 %v1147_v24, %v1091_v45 }
 0x1a4   : > { %v2083_v53 = vmax.f32 %v1148_v46, 0.0  ;;  %v884_v46 = vadd.f32 %v3460_v9, %v791_v44  ;;  %v799_v9 = vadd.f32 %v3458_v36, %v3499_v21 }
 0x1a5   : > { %v950_v25 = vpop.f32.mrf.mxu2  ;;  %v1015_v11 = vpop.f32.mrf.mxu3 }
 0x1a6   : > { %v2155_v4 = vmul.f32 %v3524_v33, %v2083_v53  ;;  %1551 = vmatmul.f32.gmra.mxu2 %v2911_v26  ;;  %1604 = vmatmul.f32.gmra.mxu3 %v2852_v62  ;;  %v1016_v8 = vadd.f32 %v1015_v11, %v946_v23  ;;  %v951_v31 = vadd.f32 %v950_v25, %v880_v54  ;;  %v3544_v53 = vpop.permute.xlu1 %2133 }
 0x1a7   : > { %1689 = vmatmul.f32.gmra.mxu0 %v3008_v51  ;;  %1782 = vmatmul.f32.gmra.mxu1 %v2852_v62 }
 0x1a8   : > { %v2172_v58 = vadd.f32 %v2171_v30, %v2155_v4  ;;  %v1095_v60 = vadd.f32 %v1094_v39, %v1016_v8  ;;  %v1102_v61 = vpop.f32.mrf.mxu0  ;;  %v1155_v24 = vpop.f32.mrf.mxu1 }
 0x1aa   : > { %v1152_v1 = vadd.f32 %v1151_v48, %v1095_v60 }
 0x1ac   : > { %v2086_v50 = vmax.f32 %v1152_v1, 0.0  ;;  %v3554_v1 = vpop.permute.xlu2 %2138 }
 0x1ad   : > { %v955_v27 = vpop.f32.mrf.mxu2  ;;  %v1021_v45 = vpop.f32.mrf.mxu3 }
 0x1ae   : > { %v2158_v51 = vmul.f32 %v3534_v35, %v2086_v50  ;;  %1555 = vmatmul.f32.gmra.mxu2 %v2978_v43  ;;  %1608 = vmatmul.f32.gmra.mxu3 %v2911_v26  ;;  %v1022_v56 = vadd.f32 %v1021_v45, %v951_v31  ;;  %v956_v25 = vadd.f32 %v955_v27, %v884_v46 }
 0x1af   : > { %1697 = vmatmul.f32.gmra.mxu0 %v3824_v49  ;;  %1786 = vmatmul.f32.gmra.mxu1 %v2911_v26 }
 0x1b0   : > { %v2173_v39 = vadd.f32 %v2172_v58, %v2158_v51  ;;  %v1099_v30 = vadd.f32 %v1098_v7, %v1022_v56  ;;  %v1106_v48 = vpop.f32.mrf.mxu0  ;;  %v1159_v20 = vpop.f32.mrf.mxu1 }
 0x1b2   : > { %v1156_v23 = vadd.f32 %v1155_v24, %v1099_v30  ;;  %v888_v24 = vadd.f32 %v3470_v41, %v799_v9  ;;  %v3561_v30 = vpop.permute.xlu0 %2143 }
 0x1b4   : > { %v2089_v11 = vmax.f32 %v1156_v23, 0.0 }
 0x1b5   : > { %v960_v4 = vpop.f32.mrf.mxu2  ;;  %v1027_v8 = vpop.f32.mrf.mxu3 }
 0x1b6   : > { %v2161_v49 = vmul.f32 %v3544_v53, %v2089_v11  ;;  %1559 = vmatmul.f32.gmra.mxu2 %v3057_v19  ;;  %1612 = vmatmul.f32.gmra.mxu3 %v2978_v43  ;;  %v1028_v29 = vadd.f32 %v1027_v8, %v956_v25  ;;  %v961_v31 = vadd.f32 %v960_v4, %v888_v24 }
 0x1b7   : > { %1705 = vmatmul.f32.gmra.mxu0 %v3825_v15  ;;  %1790 = vmatmul.f32.gmra.mxu1 %v2978_v43 }
 0x1b8   : > { %v2174_v7 = vadd.f32 %v2173_v39, %v2161_v49  ;;  %v1103_v37 = vadd.f32 %v1102_v61, %v1028_v29  ;;  %v1163_v58 = vpop.f32.mrf.mxu1  ;;  %v1379_v60 = vpop.f32.mrf.mxu0 }
 0x1ba   : > { %v1160_v54 = vadd.f32 %v1159_v20, %v1103_v37 }
 0x1bc   : > { %v2092_v50 = vmax.f32 %v1160_v54, 0.0 }
 0x1bd   : > { %v1033_v27 = vpop.f32.mrf.mxu3  ;;  %v1196_v45 = vpop.f32.mrf.mxu2 }
 0x1be   : > { %v2164_v15 = vmul.f32 %v3554_v1, %v2092_v50  ;;  %1616 = vmatmul.f32.gmra.mxu3 %v3057_v19  ;;  %1832 = vmatmul.f32.vlgmr.msra.gmra.mxu2 %v3805_v52  ;;  %v1034_v36 = vadd.f32 %v1033_v27, %v961_v31  ;;  %v1197_v20 = vadd.f32 %v1196_v45, %v3464_v6 }
 0x1bf   : > { %1794 = vmatmul.f32.gmra.mxu1 %v3057_v19  ;;  %1985 = vmatmul.f32.vlgmr.msra.gmra.mxu0 %v2850_v57 }
 0x1c0   : > { %v2175_v61 = vadd.f32 %v2174_v7, %v2164_v15  ;;  %v1107_v41 = vadd.f32 %v1106_v48, %v1034_v36 }
 0x1c1   : > { %v1384_v51 = vpop.f32.mrf.mxu0  ;;  %v1445_v56 = vpop.f32.mrf.mxu1 }
 0x1c2   : > { %v1164_v44 = vadd.f32 %v1163_v58, %v1107_v41 }
 0x1c4   : > { %v2095_v39 = vmax.f32 %v1164_v44, 0.0 }
 0x1c6   : > { %v2167_v46 = vmul.f32 %v3561_v30, %v2095_v39  ;;  %1837 = vmatmul.f32.gmra.mxu2 %v2925_v59  ;;  %1898 = vmatmul.f32.vlgmr.msra.gmra.mxu3 %v3812_v55  ;;  %v1204_v52 = vpop.f32.mrf.mxu2  ;;  %v1313_v23 = vpop.f32.mrf.mxu3  ;;  %v3827_v39 = vld [vmem:[#allocation17_spill] sm:$0xff] }
 0x1c7   : > { %v1314_v25 = vadd.f32 %v1313_v23, %v1197_v20  ;;  %2042 = vmatmul.f32.vlgmr.msra.gmra.mxu1 %v2850_v57  ;;  %1989 = vmatmul.f32.gmra.mxu0 %v2907_v22  ;;  %v1205_v59 = vadd.f32 %v1204_v52, %v3472_v42 }
 0x1c8   : > { %v3569_v48 = vadd.f32 %v2175_v61, %v2167_v46 }
 0x1c9   : > { %v1380_v11 = vadd.f32 %v1379_v60, %v1314_v25 }
 0x1cb   : > { %v1389_v4 = vpop.f32.mrf.mxu0  ;;  %v1451_v8 = vpop.f32.mrf.mxu1  ;;  %v3571_v49 = vadd.f32 %v1445_v56, %v1380_v11  ;;  %v3828_v11 = vld [vmem:[#allocation19_spill] sm:$0xff] }
 0x1ce   : > { %1842 = vmatmul.f32.gmra.mxu2 %v2996_v0  ;;  %1904 = vmatmul.f32.gmra.mxu3 %v2955_v47 }
 0x1cf   : > { %2046 = vmatmul.f32.gmra.mxu1 %v2907_v22  ;;  %1993 = vmatmul.f32.gmra.mxu0 %v2976_v17 }
 0x1d0   : > { %v1212_v57 = vpop.f32.mrf.mxu2  ;;  %v1317_v55 = vpop.f32.mrf.mxu3 }
 0x1d1   : > { %v1318_v29 = vadd.f32 %v1317_v55, %v1205_v59  ;;  %v1213_v22 = vadd.f32 %v1212_v57, %v3479_v14 }
 0x1d3   : > { %v1385_v9 = vadd.f32 %v1384_v51, %v1318_v29 }
 0x1d4   : > { %v1394_v7 = vpop.f32.mrf.mxu0  ;;  %v1457_v37 = vpop.f32.mrf.mxu1 }
 0x1d5   : > { %v3578_v58 = vadd.f32 %v1451_v8, %v1385_v9 }
 0x1d6   : > { %1847 = vmatmul.f32.gmra.mxu2 %v3092_v10  ;;  %1910 = vmatmul.f32.gmra.mxu3 %v3034_v32 }
 0x1d7   : > { %2050 = vmatmul.f32.gmra.mxu1 %v2976_v17  ;;  %1997 = vmatmul.f32.gmra.mxu0 %v3055_v13 }
 0x1d9   : > { %v1220_v47 = vpop.f32.mrf.mxu2  ;;  %v1321_v0 = vpop.f32.mrf.mxu3 }
 0x1da   : > { %v1322_v60 = vadd.f32 %v1321_v0, %v1213_v22  ;;  %v1221_v17 = vadd.f32 %v1220_v47, %v3481_v18 }
 0x1dc   : > { %v1390_v24 = vadd.f32 %v1389_v4, %v1322_v60  ;;  %v1399_v54 = vpop.f32.mrf.mxu0  ;;  %v1463_v31 = vpop.f32.mrf.mxu1  ;;  %v3829_v4 = vld [vmem:[#allocation18_spill] sm:$0xff] }
 0x1de   : > { %1852 = vmatmul.f32.gmra.mxu2 %v3817_v28  ;;  %1916 = vmatmul.f32.gmra.mxu3 %v3122_v63  ;;  %v3587_v50 = vadd.f32 %v1457_v37, %v1390_v24 }
 0x1df   : > { %2054 = vmatmul.f32.gmra.mxu1 %v3055_v13  ;;  %2001 = vmatmul.f32.gmra.mxu0 %v2852_v62 }
 0x1e1   : > { %v1228_v32 = vpop.f32.mrf.mxu2  ;;  %v1325_v10 = vpop.f32.mrf.mxu3 }
 0x1e2   : > { %v1326_v27 = vadd.f32 %v1325_v10, %v1221_v17  ;;  %v1229_v13 = vadd.f32 %v1228_v32, %v3488_v12 }
 0x1e4   : > { %v1395_v45 = vadd.f32 %v1394_v7, %v1326_v27  ;;  %v1404_v15 = vpop.f32.mrf.mxu0  ;;  %v1469_v36 = vpop.f32.mrf.mxu1  ;;  %v3830_v7 = vld [vmem:[#allocation21_spill] sm:$0xff] }
 0x1e6   : > { %1857 = vmatmul.f32.gmra.mxu2 %v2930_v38  ;;  %1922 = vmatmul.f32.gmra.mxu3 %v3818_v5  ;;  %v3594_v28 = vadd.f32 %v1463_v31, %v1395_v45 }
 0x1e7   : > { %2058 = vmatmul.f32.gmra.mxu1 %v2852_v62  ;;  %2005 = vmatmul.f32.gmra.mxu0 %v2911_v26 }
 0x1e9   : > { %v1236_v63 = vpop.f32.mrf.mxu2  ;;  %v1329_v61 = vpop.f32.mrf.mxu3 }
 0x1ea   : > { %v1330_v41 = vadd.f32 %v1329_v61, %v1229_v13  ;;  %v1237_v62 = vadd.f32 %v1236_v63, %v3490_v16 }
 0x1ec   : > { %v1400_v51 = vadd.f32 %v1399_v54, %v1330_v41  ;;  %v1409_v56 = vpop.f32.mrf.mxu0  ;;  %v1475_v44 = vpop.f32.mrf.mxu1 }
 0x1ee   : > { %1862 = vmatmul.f32.gmra.mxu2 %v2999_v34  ;;  %1928 = vmatmul.f32.gmra.mxu3 %v3827_v39  ;;  %v3601_v38 = vadd.f32 %v1469_v36, %v1400_v51 }
 0x1ef   : > { %2062 = vmatmul.f32.gmra.mxu1 %v2911_v26  ;;  %2009 = vmatmul.f32.gmra.mxu0 %v2978_v43 }
 0x1f1   : > { %v1244_v5 = vpop.f32.mrf.mxu2  ;;  %v1333_v20 = vpop.f32.mrf.mxu3 }
 0x1f2   : > { %v1334_v46 = vadd.f32 %v1333_v20, %v1237_v62  ;;  %v1245_v26 = vadd.f32 %v1244_v5, %v3492_v2 }
 0x1f4   : > { %v1405_v52 = vadd.f32 %v1404_v15, %v1334_v46  ;;  %v1414_v23 = vpop.f32.mrf.mxu0  ;;  %v1481_v25 = vpop.f32.mrf.mxu1 }
 0x1f6   : > { %1867 = vmatmul.f32.gmra.mxu2 %v3828_v11  ;;  %1934 = vmatmul.f32.gmra.mxu3 %v3829_v4  ;;  %v3608_v34 = vadd.f32 %v1475_v44, %v1405_v52 }
 0x1f7   : > { %2066 = vmatmul.f32.gmra.mxu1 %v2978_v43  ;;  %2013 = vmatmul.f32.gmra.mxu0 %v3057_v19 }
 0x1f9   : > { %v1252_v8 = vpop.f32.mrf.mxu2  ;;  %v1337_v59 = vpop.f32.mrf.mxu3 }
 0x1fa   : > { %v1338_v57 = vadd.f32 %v1337_v59, %v1245_v26  ;;  %v1253_v22 = vadd.f32 %v1252_v8, %v3499_v21 }
 0x1fc   : > { %v1410_v55 = vadd.f32 %v1409_v56, %v1338_v57  ;;  %v1487_v29 = vpop.f32.mrf.mxu1  ;;  %v1650_v9 = vpop.f32.mrf.mxu0 }
 0x1fd   : > { %v1651_v24 = vadd.f32 %v1650_v9, %v3464_v6 }
 0x1fe   : > { %1940 = vmatmul.f32.gmra.mxu3 %v3830_v7  ;;  %v3614_v37 = vadd.f32 %v1481_v25, %v1410_v55 }
 0x1ff   : > { %2070 = vmatmul.f32.gmra.mxu1 %v3057_v19 }
 0x201   : > { %v1341_v47 = vpop.f32.mrf.mxu3  ;;  %v1532_v43 = vpop.f32.mrf.mxu2 }
 0x202   : > { %v1342_v0 = vadd.f32 %v1341_v47, %v1253_v22  ;;  %v1533_v60 = vadd.f32 %v1532_v43, %v3571_v49 }
 0x204   : > { %v1415_v54 = vadd.f32 %v1414_v23, %v1342_v0  ;;  %v1658_v31 = vpop.f32.mrf.mxu0  ;;  %v1767_v17 = vpop.f32.mrf.mxu1 }
 0x205   : > { %v3620_v32 = vadd.f32 %v1767_v17, %v1651_v24  ;;  %v1659_v36 = vadd.f32 %v1658_v31, %v3472_v42  ;;  %v3831_v42 = vld [vmem:[#allocation7_spill] sm:$0xff] }
 0x206   : > { %v3622_v10 = vadd.f32 %v1487_v29, %v1415_v54 }
 0x209   : > { %v1536_v27 = vpop.f32.mrf.mxu2  ;;  %v1589_v45 = vpop.f32.mrf.mxu3 }
 0x20a   : > { %v1537_v19 = vadd.f32 %v1536_v27, %v3578_v58  ;;  %v1590_v15 = vadd.f32 %v1589_v45, %v1533_v60 }
 0x20c   : > { %v1666_v13 = vpop.f32.mrf.mxu0  ;;  %v1771_v63 = vpop.f32.mrf.mxu1  ;;  %v2075_v41 = vmax.f32 %v1590_v15, 0.0 }
 0x20d   : > { %v3626_v61 = vadd.f32 %v1771_v63, %v1659_v36  ;;  %v1667_v44 = vadd.f32 %v1666_v13, %v3479_v14 }
 0x20e   : > { %v2147_v58 = vmul.f32 %v3501_v40, %v2075_v41 }
 0x211   : > { %v1540_v49 = vpop.f32.mrf.mxu2  ;;  %v1593_v6 = vpop.f32.mrf.mxu3 }
 0x212   : > { %v1541_v51 = vadd.f32 %v1540_v49, %v3587_v50  ;;  %v1594_v56 = vadd.f32 %v1593_v6, %v1537_v19 }
 0x214   : > { %v2078_v39 = vmax.f32 %v1594_v56, 0.0  ;;  %v1674_v62 = vpop.f32.mrf.mxu0  ;;  %v1775_v5 = vpop.f32.mrf.mxu1 }
 0x215   : > { %v3630_v20 = vadd.f32 %v1775_v5, %v1667_v44  ;;  %v1675_v50 = vadd.f32 %v1674_v62, %v3481_v18 }
 0x216   : > { %v2150_v46 = vmul.f32 %v3831_v42, %v2078_v39 }
 0x218   : > { %v2183_v52 = vadd.f32 %v2150_v46, %v2147_v58 }
 0x219   : > { %v1544_v23 = vpop.f32.mrf.mxu2  ;;  %v1597_v25 = vpop.f32.mrf.mxu3 }
 0x21a   : > { %v1545_v11 = vadd.f32 %v1544_v23, %v3594_v28  ;;  %v1598_v4 = vadd.f32 %v1597_v25, %v1541_v51 }
 0x21c   : > { %v2081_v26 = vmax.f32 %v1598_v4, 0.0  ;;  %v1682_v8 = vpop.f32.mrf.mxu0  ;;  %v1779_v14 = vpop.f32.mrf.mxu1 }
 0x21d   : > { %v3636_v59 = vadd.f32 %v1779_v14, %v1675_v50  ;;  %v1683_v47 = vadd.f32 %v1682_v8, %v3488_v12 }
 0x21e   : > { %v2153_v57 = vmul.f32 %v3514_v3, %v2081_v26 }
 0x220   : > { %v2184_v55 = vadd.f32 %v2183_v52, %v2153_v57 }
 0x221   : > { %v1548_v29 = vpop.f32.mrf.mxu2  ;;  %v1601_v9 = vpop.f32.mrf.mxu3 }
 0x222   : > { %v1549_v7 = vadd.f32 %v1548_v29, %v3601_v38  ;;  %v1602_v22 = vadd.f32 %v1601_v9, %v1545_v11 }
 0x224   : > { %v2084_v43 = vmax.f32 %v1602_v22, 0.0  ;;  %v1690_v28 = vpop.f32.mrf.mxu0  ;;  %v1783_v0 = vpop.f32.mrf.mxu1 }
 0x225   : > { %v3641_v60 = vadd.f32 %v1783_v0, %v1683_v47  ;;  %v1691_v45 = vadd.f32 %v1690_v28, %v3490_v16 }
 0x226   : > { %v2156_v18 = vmul.f32 %v3524_v33, %v2084_v43 }
 0x228   : > { %v2185_v24 = vadd.f32 %v2184_v55, %v2156_v18 }
 0x229   : > { %v1552_v54 = vpop.f32.mrf.mxu2  ;;  %v1605_v31 = vpop.f32.mrf.mxu3 }
 0x22a   : > { %v1553_v17 = vadd.f32 %v1552_v54, %v3608_v34  ;;  %v1606_v27 = vadd.f32 %v1605_v31, %v1549_v7 }
 0x22c   : > { %v2087_v19 = vmax.f32 %v1606_v27, 0.0  ;;  %v3646_v38 = vpop.f32.mrf.mxu0  ;;  %v1787_v15 = vpop.f32.mrf.mxu1 }
 0x22d   : > { %v3648_v12 = vadd.f32 %v1787_v15, %v1691_v45 }
 0x22e   : > { %v2159_v36 = vmul.f32 %v3534_v35, %v2087_v19 }
 0x230   : > { %v2186_v13 = vadd.f32 %v2185_v24, %v2159_v36 }
 0x231   : > { %v1556_v63 = vpop.f32.mrf.mxu2  ;;  %v1609_v49 = vpop.f32.mrf.mxu3 }
 0x232   : > { %v1557_v6 = vadd.f32 %v1556_v63, %v3614_v37  ;;  %v1610_v41 = vadd.f32 %v1609_v49, %v1553_v17  ;;  %v2177_v37 = vrot.slane %v3569_v48, 4 }
 0x234   : > { %v2090_v51 = vmax.f32 %v1610_v41, 0.0  ;;  %v3652_v56 = vpop.f32.mrf.mxu0  ;;  %v3654_v34 = vpop.f32.mrf.mxu1  ;;  %v2178_v4 = vadd.f32 %v2177_v37, %v3569_v48 }
 0x236   : > { %v2162_v16 = vmul.f32 %v3544_v53, %v2090_v51  ;;  %v2179_v29 = vrot.slane %v2178_v4, 2 }
 0x238   : > { %v2187_v44 = vadd.f32 %v2186_v13, %v2162_v16  ;;  %v2180_v22 = vadd.f32 %v2179_v29, %v2178_v4 }
 0x239   : > { %v1560_v39 = vpop.f32.mrf.mxu2  ;;  %v1613_v62 = vpop.f32.mrf.mxu3 }
 0x23a   : > { %v1561_v5 = vadd.f32 %v1560_v39, %v3622_v10  ;;  %v1614_v58 = vadd.f32 %v1613_v62, %v1557_v6  ;;  %v2181_v24 = vrot.slane %v2180_v22, 1 }
 0x23c   : > { %v2093_v46 = vmax.f32 %v1614_v58, 0.0  ;;  %v3658_v52 = vpop.f32.mrf.mxu1  ;;  %v1986_v23 = vpop.f32.mrf.mxu0  ;;  %v2182_v36 = vadd.f32 %v2181_v24, %v2180_v22 }
 0x23e   : > { %v2165_v25 = vmul.f32 %v3554_v1, %v2093_v46 }
 0x240   : > { %v2188_v11 = vadd.f32 %v2187_v44, %v2165_v25 }
 0x241   : > { %v1617_v50 = vpop.f32.mrf.mxu3  ;;  %v1833_v26 = vpop.f32.mrf.mxu2 }
 0x242   : > { %v1618_v8 = vadd.f32 %v1617_v50, %v1561_v5  ;;  %v1834_v7 = vadd.f32 %v1833_v26, %v3620_v32  ;;  %v3666_v32 = vstv %s2209_s22  ;;  %s2399_s22 = scalar_lea.hbm %s3733_s9, 9 }
 0x243   : > { %v2211_v16 = vadd.f32 %v3666_v32, %v2182_v36  ;;  %p2401_p1 = scmp.lt.s32.totalorder %s2399_s22, %s2395_s30 }
 0x244   : > { %v2096_v14 = vmax.f32 %v1618_v8, 0.0  ;;  %v2043_v57 = vpop.f32.mrf.mxu1  ;;  %v1990_v55 = vpop.f32.mrf.mxu0 }
 0x245   : > { %v2214_v25 = vand.u32 2147483647, %v2211_v16  ;;  %p2402_p2 = por %p2401_p1, %p2400_p0 }
 0x246   : > { %v2168_v10 = vmul.f32 %v3561_v30, %v2096_v14 }
 0x247   : > { %p2403_p3 = pnand %p2402_p2, %p2398_p13 }
 0x248   : > { %v2189_v9 = vadd.f32 %v2188_v11, %v2168_v10 }
 0x249   : > { %v1838_v47 = vpop.f32.mrf.mxu2  ;;  %v1899_v43 = vpop.f32.mrf.mxu3 }
 0x24a   : > { %v2190_v28 = vrot.slane %v2189_v9, 4  ;;  %v1900_v0 = vadd.f32 %v1899_v43, %v1834_v7  ;;  %v1839_v45 = vadd.f32 %v1838_v47, %v3626_v61 }
 0x24c   : > { %v2191_v18 = vadd.f32 %v2190_v28, %v2189_v9  ;;  %v2047_v48 = vpop.f32.mrf.mxu1  ;;  %v1987_v31 = vadd.f32 %v1986_v23, %v1900_v0  ;;  %v1994_v17 = vpop.f32.mrf.mxu0 }
 0x24e   : > { %v2192_v54 = vrot.slane %v2191_v18, 2  ;;  %v2044_v63 = vadd.f32 %v2043_v57, %v1987_v31 }
 0x250   : > { %v2193_v27 = vadd.f32 %v2192_v54, %v2191_v18  ;;  %v2076_v39 = vmax.f32 %v2044_v63, 0.0 }
 0x251   : > { %v1843_v19 = vpop.f32.mrf.mxu2  ;;  %v1905_v15 = vpop.f32.mrf.mxu3 }
 0x252   : > { %v2194_v13 = vrot.slane %v2193_v27, 1  ;;  %v1906_v49 = vadd.f32 %v1905_v15, %v1839_v45  ;;  %v1844_v5 = vadd.f32 %v1843_v19, %v3630_v20  ;;  %v2148_v11 = vmul.f32 %v3501_v40, %v2076_v39 }
 0x254   : > { %v2195_v6 = vadd.f32 %v2194_v13, %v2193_v27  ;;  %v1991_v41 = vadd.f32 %v1990_v55, %v1906_v49  ;;  %v2051_v51 = vpop.f32.mrf.mxu1  ;;  %v1998_v58 = vpop.f32.mrf.mxu0 }
 0x256   : > { %v2212_v44 = vadd.f32 %v3666_v32, %v2195_v6  ;;  %v2048_v62 = vadd.f32 %v2047_v48, %v1991_v41 }
 0x258   : > { %v2079_v61 = vmax.f32 %v2048_v62, 0.0  ;;  %v2215_v46 = vand.u32 2147483647, %v2212_v44 }
 0x259   : > { %v1848_v23 = vpop.f32.mrf.mxu2  ;;  %v1911_v37 = vpop.f32.mrf.mxu3 }
 0x25a   : > { %v2151_v4 = vmul.f32 %v3831_v42, %v2079_v61  ;;  %v1912_v50 = vadd.f32 %v1911_v37, %v1844_v5  ;;  %v2220_v26 = vrot.slane %v2215_v46, 7  ;;  %v1849_v20 = vadd.f32 %v1848_v23, %v3636_v59 }
 0x25c   : > { %v2196_v8 = vadd.f32 %v2151_v4, %v2148_v11  ;;  %v1995_v14 = vadd.f32 %v1994_v17, %v1912_v50  ;;  %v2055_v57 = vpop.f32.mrf.mxu1  ;;  %v3673_v55 = vsel %vm2222_vm1, %v2214_v25, %v2220_v26  ;;  %v2002_v43 = vpop.f32.mrf.mxu0 }
 0x25e   : > { %v2052_v29 = vadd.f32 %v2051_v51, %v1995_v14 }
 0x260   : > { %v2082_v10 = vmax.f32 %v2052_v29, 0.0 }
 0x261   : > { %v1853_v9 = vpop.f32.mrf.mxu2  ;;  %v1917_v7 = vpop.f32.mrf.mxu3 }
 0x262   : > { %v2154_v22 = vmul.f32 %v3514_v3, %v2082_v10  ;;  %v1918_v47 = vadd.f32 %v1917_v7, %v1849_v20  ;;  %v1854_v18 = vadd.f32 %v1853_v9, %v3641_v60  ;;  %v1699_v60 = vadd.f32 %v3646_v38, %v3492_v2 }
 0x264   : > { %v2197_v40 = vadd.f32 %v2196_v8, %v2154_v22  ;;  %v1999_v28 = vadd.f32 %v1998_v58, %v1918_v47  ;;  %v2059_v42 = vpop.f32.mrf.mxu1  ;;  %v2006_v45 = vpop.f32.mrf.mxu0  ;;  %v2227_v47 = vlaneseq }
 0x266   : > { %v2056_v0 = vadd.f32 %v2055_v57, %v1999_v28  ;;  %vm2229_vm3 = vcmp.lt.s32.totalorder %v2227_v47, 384 }
 0x268   : > { %v2085_v48 = vmax.f32 %v2056_v0, 0.0 }
 0x269   : > { %v1858_v24 = vpop.f32.mrf.mxu2  ;;  %v1923_v54 = vpop.f32.mrf.mxu3 }
 0x26a   : > { %v2157_v31 = vmul.f32 %v3524_v33, %v2085_v48  ;;  %v1924_v17 = vadd.f32 %v1923_v54, %v1854_v18  ;;  %v1859_v3 = vadd.f32 %v1858_v24, %v3648_v12  ;;  %v1792_v33 = vadd.f32 %v3654_v34, %v1699_v60 }
 0x26c   : > { %v2198_v59 = vadd.f32 %v2197_v40, %v2157_v31  ;;  %v2003_v27 = vadd.f32 %v2002_v43, %v1924_v17  ;;  %v2063_v15 = vpop.f32.mrf.mxu1  ;;  %v2010_v44 = vpop.f32.mrf.mxu0 }
 0x26e   : > { %v2060_v19 = vadd.f32 %v2059_v42, %v2003_v27 }
 0x270   : > { %v2088_v36 = vmax.f32 %v2060_v19, 0.0 }
 0x271   : > { %v1929_v13 = vpop.f32.mrf.mxu3  ;;  %v1863_v6 = vpop.f32.mrf.mxu2 }
 0x272   : > { %v2160_v63 = vmul.f32 %v3534_v35, %v2088_v36  ;;  %v1930_v49 = vadd.f32 %v1929_v13, %v1859_v3  ;;  %v1864_v39 = vadd.f32 %v1863_v6, %v1792_v33  ;;  %v1707_v35 = vadd.f32 %v3652_v56, %v3499_v21 }
 0x274   : > { %v2199_v41 = vadd.f32 %v2198_v59, %v2160_v63  ;;  %v2007_v51 = vadd.f32 %v2006_v45, %v1930_v49  ;;  %v2067_v61 = vpop.f32.mrf.mxu1  ;;  %v1796_v2 = vadd.f32 %v3658_v52, %v1707_v35  ;;  %v2014_v11 = vpop.f32.mrf.mxu0 }
 0x276   : > { %v2064_v16 = vadd.f32 %v2063_v15, %v2007_v51 }
 0x278   : > { %v2091_v62 = vmax.f32 %v2064_v16, 0.0 }
 0x279   : > { %v1935_v5 = vpop.f32.mrf.mxu3  ;;  %v1868_v37 = vpop.f32.mrf.mxu2 }
 0x27a   : > { %v2163_v12 = vmul.f32 %v3544_v53, %v2091_v62  ;;  %v1936_v58 = vadd.f32 %v1935_v5, %v1864_v39  ;;  %v1869_v25 = vadd.f32 %v1868_v37, %v1796_v2 }
 0x27c   : > { %v2200_v46 = vadd.f32 %v2199_v41, %v2163_v12  ;;  %v2011_v23 = vadd.f32 %v2010_v44, %v1936_v58  ;;  %v2071_v26 = vpop.f32.mrf.mxu1 }
 0x27e   : > { %v2068_v38 = vadd.f32 %v2067_v61, %v2011_v23 }
 0x280   : > { %v2094_v4 = vmax.f32 %v2068_v38, 0.0 }
 0x281   : > { %v1941_v34 = vpop.f32.mrf.mxu3 }
 0x282   : > { %v1942_v50 = vadd.f32 %v1941_v34, %v1869_v25  ;;  %v2166_v53 = vmul.f32 %v3554_v1, %v2094_v4 }
 0x284   : > { %v2015_v8 = vadd.f32 %v2014_v11, %v1942_v50  ;;  %v2201_v21 = vadd.f32 %v2200_v46, %v2166_v53 }
 0x286   : > { %v2072_v14 = vadd.f32 %v2071_v26, %v2015_v8 }
 0x288   : > { %v2097_v57 = vmax.f32 %v2072_v14, 0.0 }
 0x28a   : > { %v2169_v56 = vmul.f32 %v3561_v30, %v2097_v57 }
 0x28c   : > { %v2202_v29 = vadd.f32 %v2201_v21, %v2169_v56 }
 0x28e   : > { %v2203_v20 = vrot.slane %v2202_v29, 4 }
 0x290   : > { %v2204_v52 = vadd.f32 %v2203_v20, %v2202_v29 }
 0x292   : > { %v2205_v10 = vrot.slane %v2204_v52, 2 }
 0x294   : > { %v2206_v9 = vadd.f32 %v2205_v10, %v2204_v52 }
 0x296   : > { %v2207_v7 = vrot.slane %v2206_v9, 1 }
 0x298   : > { %v2208_v22 = vadd.f32 %v2207_v7, %v2206_v9 }
 0x29a   : > { %v2213_v1 = vadd.f32 %v3666_v32, %v2208_v22 }
 0x29c   : > { %v2216_v43 = vand.u32 2147483647, %v2213_v1 }
 0x29e   : > { %v2221_v30 = vrot.slane %v2216_v43, 6 }
 0x2a0   : > { %v2225_v40 = vsel %vm2224_vm2, %v3673_v55, %v2221_v30 }
 0x2a1   : > { %2231 = vst.msk [vmem:[%s339_s28] sm:$0x7] %vm2229_vm3, %v2225_v40 }
 0x2a2   : > { %2406 = shalt.err (!%p2403_p3)
}
 0x2a3   : > { %2336 = dma.vmem_to_hbm [thread:$0]  (%p2534_p5), %s2246_s29, 48, %s2248_s8, %s2233_s10  }
 0x2a4 PF: > { %p2342_p4 = scmp.ge.s32.totalorder %s2441_s14, 2  ;;  %s2259_s23 = sand.u32 1, %s2429_s11  }
 0x2a5   : > { %s2260_s26 = scalar_lea.sflag [#allocation4], %s2259_s23 }
 0x2a6   : > { %p2339_p7 = pnand %p2342_p4, %p2538_p6 }
 0x2a8   : > { %p2340_p8 = pneg %p2339_p7 }
 0x2aa   : > { %2424 = dma.done.wait (%p2340_p8), %s2260_s26, 48  }
 0x2ab   : > { %2426 = vsyncadd (%p2340_p8), %s2260_s26, 4294967248  ;;  %p20_p9 = scmp.ge.s32.totalorder %s2520_s16, 5   ;;  %s3832_s11 = smov %s2433_s12 }
 0x2ac   : > { %s3833_s12 = smov %s2437_s13  ;;  %s3834_s13 = smov %s2532_s19 }
 0x2ad   : > { %s3835_s14 = smov %s2520_s16  ;;  %22 = sbr.rel (!%p20_p9) target bundleno = 5 (0x5), region = 94 }
 0x2b2   :  { %2266 = vsyncpa [#allocation4], 1 }
 0x2b3   :  { %2268 = vsyncpa [#allocation4 + $0x1], 1 }

</bundles_post_ra>
